<compile_context>
chip_gen: v7x
topology: tpu7x:2x2x1
jax: 0.10.0
libtpu: 0.0.40
codegen_flags: <defaults>
</compile_context>

<pallas_src>
import functools

import jax
import jax.numpy as jnp
from jax import lax
from jax.experimental import pallas as pl
from jax.experimental.pallas import tpu as pltpu

N_HIDDEN = 50
IN_FEATURES = 2
OUT_FEATURES = 1


def _default_compute_dtype():
    """bf16 activations on chips with bf16 VPU/EUP (v6e/v7x), else f32."""
    try:
        kind = jax.devices()[0].device_kind.lower()
    except Exception:
        return jnp.float32
    if ("v6" in kind) or ("v7" in kind) or ("tpu7" in kind):
        return jnp.bfloat16
    return jnp.float32


def _choose_tile_n(n):
    """Large tile to amortize per-step overhead, but keep >= 2 tiles (v7x)."""
    half = -(-n // 2)                  # cdiv(n, 2)
    half = -(-half // 128) * 128       # round up to a lane multiple
    return int(min(4096, max(128, half)))


def _mlp_kernel(x_ref, w1_ref, wh_ref, w6_ref, bh_ref, b6_ref, o_ref,
                *, compute_dtype=jnp.float32):
    cd = compute_dtype

    # Layer 1: contract over the feature axis of the (tile_n, 2) block so the
    # result is already batch-on-lanes: (50, 2) x (tile_n, 2)^T -> (50, tile_n).
    x = x_ref[...].astype(cd)
    w1 = w1_ref[...].astype(cd)
    h = lax.dot_general(w1, x, (((1,), (1,)), ((), ())),
                        preferred_element_type=jnp.float32)
    h = h + bh_ref[0]                       # (50, 1) f32 broadcast over lanes
    h = jnp.tanh(h.astype(cd))

    # Layers 2..5: (50, 50) @ (50, tile_n) with f32 MXU accumulation.
    for l in range(4):
        w = wh_ref[l].astype(cd)
        y = jnp.dot(w, h, preferred_element_type=jnp.float32)
        y = y + bh_ref[l + 1]
        h = jnp.tanh(y.astype(cd))

    # Layer 6 (no activation): (1, 50) @ (50, tile_n) -> (1, tile_n).
    w6 = w6_ref[...].astype(cd)
    y = jnp.dot(w6, h, preferred_element_type=jnp.float32) + b6_ref[...]
    o_ref[...] = y.astype(o_ref.dtype)


def deep_neural_network_forward(x, params, *, tile_n=None, compute_dtype=None):
    """x: (N, 2) float32. params: torch-style weights (out, in), biases (out, 1).

    Returns (N, 1) float32.  Any N is accepted (ragged tail handled by Pallas
    partial blocks).  compute_dtype=None auto-selects bf16 on v6e/v7x and f32
    elsewhere; pass jnp.float32 explicitly when full PINN accuracy is needed.
    """
    n, f = x.shape
    assert f == IN_FEATURES

    if compute_dtype is None:
        compute_dtype = _default_compute_dtype()
    if tile_n is None:
        tile_n = _choose_tile_n(n)
    assert tile_n % 128 == 0 and tile_n >= 128, "tile_n must be lane-aligned"

    n_tiles = pl.cdiv(n, tile_n)

    # Stack the resident weights/biases into a handful of inputs.
    w1 = params["w1"]                                               # (50, 2)
    wh = jnp.stack([params["w2"], params["w3"],
                    params["w4"], params["w5"]])                    # (4, 50, 50)
    w6 = params["w6"]                                               # (1, 50)
    bh = jnp.stack([params["b1"], params["b2"], params["b3"],
                    params["b4"], params["b5"]])                    # (5, 50, 1)
    b6 = params["b6"]                                               # (1, 1)

    in_specs = [
        pl.BlockSpec((tile_n, IN_FEATURES), lambda i: (i, 0)),
        pl.BlockSpec(w1.shape, lambda i: (0, 0)),
        pl.BlockSpec(wh.shape, lambda i: (0, 0, 0)),
        pl.BlockSpec(w6.shape, lambda i: (0, 0)),
        pl.BlockSpec(bh.shape, lambda i: (0, 0, 0)),
        pl.BlockSpec(b6.shape, lambda i: (0, 0)),
    ]
    out_spec = pl.BlockSpec((OUT_FEATURES, tile_n), lambda i: (0, i))

    # Advisory cost hint for the XLA scheduler.
    flops = 2 * n * (IN_FEATURES * N_HIDDEN
                     + 4 * N_HIDDEN * N_HIDDEN
                     + N_HIDDEN * OUT_FEATURES)
    transcendentals = 5 * N_HIDDEN * n
    weight_bytes = 4 * int(w1.size + wh.size + w6.size + bh.size + b6.size)
    bytes_accessed = 4 * n * (IN_FEATURES + OUT_FEATURES) + weight_bytes

    yt = pl.pallas_call(
        functools.partial(_mlp_kernel, compute_dtype=compute_dtype),
        out_shape=jax.ShapeDtypeStruct((OUT_FEATURES, n), jnp.float32),
        grid_spec=pltpu.PrefetchScalarGridSpec(
            num_scalar_prefetch=0,
            grid=(n_tiles,),
            in_specs=in_specs,
            out_specs=out_spec,
        ),
        compiler_params=pltpu.CompilerParams(
            dimension_semantics=("parallel",)),
        cost_estimate=pl.CostEstimate(
            flops=flops,
            transcendentals=transcendentals,
            bytes_accessed=bytes_accessed),
    )(x, w1, wh, w6, bh, b6)

    # (1, N) -> (N, 1)
    return jnp.transpose(yt)


def init_params(key):
    """Deterministic, torch.nn.Linear-style init: W (out, in), b (out, 1)."""
    sizes = [
        (N_HIDDEN, IN_FEATURES),
        (N_HIDDEN, N_HIDDEN),
        (N_HIDDEN, N_HIDDEN),
        (N_HIDDEN, N_HIDDEN),
        (N_HIDDEN, N_HIDDEN),
        (OUT_FEATURES, N_HIDDEN),
    ]
    params = {}
    for idx, (fan_out, fan_in) in enumerate(sizes, start=1):
        key, kw, kb = jax.random.split(key, 3)
        bound = 1.0 / jnp.sqrt(fan_in)
        params[f"w{idx}"] = jax.random.uniform(
            kw, (fan_out, fan_in), jnp.float32, -bound, bound)
        params[f"b{idx}"] = jax.random.uniform(
            kb, (fan_out, 1), jnp.float32, -bound, bound)
    return params


def reference_forward(x, params):
    h = x
    for idx in range(1, 6):
        h = jnp.tanh(h @ params[f"w{idx}"].T + params[f"b{idx}"].T)
    return h @ params["w6"].T + params["b6"].T


if __name__ == "__main__":
    key = jax.random.PRNGKey(0)
    key, kx = jax.random.split(key)

    # Small batch of (x, t) collocation points; deliberately NOT a multiple of
    # the auto tile (tile_n=512 -> 2 grid steps, ragged tail on the 2nd).
    batch = 1000
    x = jax.random.normal(kx, (batch, IN_FEATURES), dtype=jnp.float32)
    params = init_params(key)
    ref = reference_forward(x, params)

    # f32 path (the v5e default / accuracy mode): tight correctness gate.
    fwd_f32 = jax.jit(functools.partial(deep_neural_network_forward,
                                        compute_dtype=jnp.float32))
    out = jax.block_until_ready(fwd_f32(x, params))
    assert out.shape == (batch, OUT_FEATURES)
    assert jnp.allclose(out, ref, atol=1e-5, rtol=1e-5), "f32 mismatch vs reference"

    # Auto path: bf16 activations on v6e/v7x (throughput mode, reduced
    # precision by construction) -- sanity-check with a loose tolerance.
    if _default_compute_dtype() != jnp.float32:
        fwd_auto = jax.jit(deep_neural_network_forward)
        out_auto = jax.block_until_ready(fwd_auto(x, params))
        assert out_auto.shape == (batch, OUT_FEATURES)
        assert bool(jnp.all(jnp.isfinite(out_auto)))
        assert jnp.allclose(out_auto, ref, atol=1e-1, rtol=1e-1), "bf16 path diverged"

    print("KERNEL_OK")
</pallas_src>

<mosaic_0001>
module attributes {stable_mosaic.version = 11 : i64} {
  func.func @_mlp_kernel(%arg0: i32, %arg1: memref<512x2xf32, #tpu.memory_space<vmem>>, %arg2: memref<50x2xf32, #tpu.memory_space<vmem>>, %arg3: memref<4x50x50xf32, #tpu.memory_space<vmem>>, %arg4: memref<1x50xf32, #tpu.memory_space<vmem>>, %arg5: memref<5x50x1xf32, #tpu.memory_space<vmem>>, %arg6: memref<1x1xf32, #tpu.memory_space<vmem>>, %arg7: memref<1x512xf32, #tpu.memory_space<vmem>>) attributes {dimension_semantics = [#tpu.dimension_semantics<parallel>], iteration_bounds = array<i64: 2>, scalar_prefetch = 0 : i64, scratch_operands = 0 : i64, tpu.core_type = #tpu.core_type<tc>, window_params = [{transform_indices = @transform_0, window_bounds = array<i64: 512, 2>}, {pipeline_mode = #tpu.pipeline_mode<synchronous>, transform_indices = @transform_1, window_bounds = array<i64: 50, 2>}, {pipeline_mode = #tpu.pipeline_mode<synchronous>, transform_indices = @transform_2, window_bounds = array<i64: 4, 50, 50>}, {pipeline_mode = #tpu.pipeline_mode<synchronous>, transform_indices = @transform_3, window_bounds = array<i64: 1, 50>}, {pipeline_mode = #tpu.pipeline_mode<synchronous>, transform_indices = @transform_4, window_bounds = array<i64: 5, 50, 1>}, {pipeline_mode = #tpu.pipeline_mode<synchronous>, transform_indices = @transform_5, window_bounds = array<i64: 1, 1>}, {transform_indices = @transform_6, window_bounds = array<i64: 1, 512>}]} {
    %c0 = arith.constant 0 : index
    %c0_0 = arith.constant 0 : index
    %0 = vector.load %arg1[%c0, %c0_0] : memref<512x2xf32, #tpu.memory_space<vmem>>, vector<512x2xf32>
    %c0_1 = arith.constant 0 : index
    %c0_2 = arith.constant 0 : index
    %1 = vector.load %arg2[%c0_1, %c0_2] : memref<50x2xf32, #tpu.memory_space<vmem>>, vector<50x2xf32>
    %cst = arith.constant dense<0.000000e+00> : vector<50x512xf32>
    %2 = tpu.matmul %1, %0, %cst {dimension_numbers = #tpu.dot_dimension_numbers<[1], [1], [0], [0], [0, 0, 1, 0], [], []>} : vector<50x2xf32>, vector<512x2xf32>, vector<50x512xf32> -> vector<50x512xf32>
    %c0_3 = arith.constant 0 : index
    %c0_4 = arith.constant 0 : index
    %c0_5 = arith.constant 0 : index
    %3 = vector.load %arg5[%c0_3, %c0_4, %c0_5] : memref<5x50x1xf32, #tpu.memory_space<vmem>>, vector<1x50x1xf32>
    %4 = vector.shape_cast %3 : vector<1x50x1xf32> to vector<50x1xf32>
    %5 = vector.broadcast %4 : vector<50x1xf32> to vector<50x512xf32>
    %6 = arith.addf %2, %5 : vector<50x512xf32>
    %7 = math.tanh %6 : vector<50x512xf32>
    %c0_6 = arith.constant 0 : index
    %c0_7 = arith.constant 0 : index
    %c0_8 = arith.constant 0 : index
    %8 = vector.load %arg3[%c0_6, %c0_7, %c0_8] : memref<4x50x50xf32, #tpu.memory_space<vmem>>, vector<1x50x50xf32>
    %9 = vector.shape_cast %8 : vector<1x50x50xf32> to vector<50x50xf32>
    %cst_9 = arith.constant dense<0.000000e+00> : vector<50x512xf32>
    %10 = tpu.matmul %9, %7, %cst_9 {dimension_numbers = #tpu.dot_dimension_numbers<[1], [0], [0], [1], [0, 0, 1, 1], [], []>} : vector<50x50xf32>, vector<50x512xf32>, vector<50x512xf32> -> vector<50x512xf32>
    %c1 = arith.constant 1 : index
    %c0_10 = arith.constant 0 : index
    %c0_11 = arith.constant 0 : index
    %11 = vector.load %arg5[%c1, %c0_10, %c0_11] : memref<5x50x1xf32, #tpu.memory_space<vmem>>, vector<1x50x1xf32>
    %12 = vector.shape_cast %11 : vector<1x50x1xf32> to vector<50x1xf32>
    %13 = vector.broadcast %12 : vector<50x1xf32> to vector<50x512xf32>
    %14 = arith.addf %10, %13 : vector<50x512xf32>
    %15 = math.tanh %14 : vector<50x512xf32>
    %c1_12 = arith.constant 1 : index
    %c0_13 = arith.constant 0 : index
    %c0_14 = arith.constant 0 : index
    %16 = vector.load %arg3[%c1_12, %c0_13, %c0_14] : memref<4x50x50xf32, #tpu.memory_space<vmem>>, vector<1x50x50xf32>
    %17 = vector.shape_cast %16 : vector<1x50x50xf32> to vector<50x50xf32>
    %cst_15 = arith.constant dense<0.000000e+00> : vector<50x512xf32>
    %18 = tpu.matmul %17, %15, %cst_15 {dimension_numbers = #tpu.dot_dimension_numbers<[1], [0], [0], [1], [0, 0, 1, 1], [], []>} : vector<50x50xf32>, vector<50x512xf32>, vector<50x512xf32> -> vector<50x512xf32>
    %c2 = arith.constant 2 : index
    %c0_16 = arith.constant 0 : index
    %c0_17 = arith.constant 0 : index
    %19 = vector.load %arg5[%c2, %c0_16, %c0_17] : memref<5x50x1xf32, #tpu.memory_space<vmem>>, vector<1x50x1xf32>
    %20 = vector.shape_cast %19 : vector<1x50x1xf32> to vector<50x1xf32>
    %21 = vector.broadcast %20 : vector<50x1xf32> to vector<50x512xf32>
    %22 = arith.addf %18, %21 : vector<50x512xf32>
    %23 = math.tanh %22 : vector<50x512xf32>
    %c2_18 = arith.constant 2 : index
    %c0_19 = arith.constant 0 : index
    %c0_20 = arith.constant 0 : index
    %24 = vector.load %arg3[%c2_18, %c0_19, %c0_20] : memref<4x50x50xf32, #tpu.memory_space<vmem>>, vector<1x50x50xf32>
    %25 = vector.shape_cast %24 : vector<1x50x50xf32> to vector<50x50xf32>
    %cst_21 = arith.constant dense<0.000000e+00> : vector<50x512xf32>
    %26 = tpu.matmul %25, %23, %cst_21 {dimension_numbers = #tpu.dot_dimension_numbers<[1], [0], [0], [1], [0, 0, 1, 1], [], []>} : vector<50x50xf32>, vector<50x512xf32>, vector<50x512xf32> -> vector<50x512xf32>
    %c3 = arith.constant 3 : index
    %c0_22 = arith.constant 0 : index
    %c0_23 = arith.constant 0 : index
    %27 = vector.load %arg5[%c3, %c0_22, %c0_23] : memref<5x50x1xf32, #tpu.memory_space<vmem>>, vector<1x50x1xf32>
    %28 = vector.shape_cast %27 : vector<1x50x1xf32> to vector<50x1xf32>
    %29 = vector.broadcast %28 : vector<50x1xf32> to vector<50x512xf32>
    %30 = arith.addf %26, %29 : vector<50x512xf32>
    %31 = math.tanh %30 : vector<50x512xf32>
    %c3_24 = arith.constant 3 : index
    %c0_25 = arith.constant 0 : index
    %c0_26 = arith.constant 0 : index
    %32 = vector.load %arg3[%c3_24, %c0_25, %c0_26] : memref<4x50x50xf32, #tpu.memory_space<vmem>>, vector<1x50x50xf32>
    %33 = vector.shape_cast %32 : vector<1x50x50xf32> to vector<50x50xf32>
    %cst_27 = arith.constant dense<0.000000e+00> : vector<50x512xf32>
    %34 = tpu.matmul %33, %31, %cst_27 {dimension_numbers = #tpu.dot_dimension_numbers<[1], [0], [0], [1], [0, 0, 1, 1], [], []>} : vector<50x50xf32>, vector<50x512xf32>, vector<50x512xf32> -> vector<50x512xf32>
    %c4 = arith.constant 4 : index
    %c0_28 = arith.constant 0 : index
    %c0_29 = arith.constant 0 : index
    %35 = vector.load %arg5[%c4, %c0_28, %c0_29] : memref<5x50x1xf32, #tpu.memory_space<vmem>>, vector<1x50x1xf32>
    %36 = vector.shape_cast %35 : vector<1x50x1xf32> to vector<50x1xf32>
    %37 = vector.broadcast %36 : vector<50x1xf32> to vector<50x512xf32>
    %38 = arith.addf %34, %37 : vector<50x512xf32>
    %39 = math.tanh %38 : vector<50x512xf32>
    %c0_30 = arith.constant 0 : index
    %c0_31 = arith.constant 0 : index
    %40 = vector.load %arg4[%c0_30, %c0_31] : memref<1x50xf32, #tpu.memory_space<vmem>>, vector<1x50xf32>
    %cst_32 = arith.constant dense<0.000000e+00> : vector<1x512xf32>
    %41 = tpu.matmul %40, %39, %cst_32 {dimension_numbers = #tpu.dot_dimension_numbers<[1], [0], [0], [1], [0, 0, 1, 1], [], []>} : vector<1x50xf32>, vector<50x512xf32>, vector<1x512xf32> -> vector<1x512xf32>
    %c0_33 = arith.constant 0 : index
    %c0_34 = arith.constant 0 : index
    %42 = vector.load %arg6[%c0_33, %c0_34] : memref<1x1xf32, #tpu.memory_space<vmem>>, vector<1x1xf32>
    %43 = vector.broadcast %42 : vector<1x1xf32> to vector<1x512xf32>
    %44 = arith.addf %41, %43 : vector<1x512xf32>
    %c0_35 = arith.constant 0 : index
    %c0_36 = arith.constant 0 : index
    %45 = vector.load %arg7[%c0_35, %c0_36] : memref<1x512xf32, #tpu.memory_space<vmem>>, vector<1x512xf32>
    tpu.vector_store %arg7[%c0_35, %c0_36], %44 {strides = array<i32>} : memref<1x512xf32, #tpu.memory_space<vmem>>, vector<1x512xf32>,
    return
  }
  func.func @transform_0(%arg0: i32) -> (i32, i32) {
    %c0_i32 = arith.constant 0 : i32
    %c0_i32_0 = arith.constant 0 : i32
    return %arg0, %c0_i32 : i32, i32
  }
  func.func @transform_1(%arg0: i32) -> (i32, i32) {
    %c0_i32 = arith.constant 0 : i32
    %c0_i32_0 = arith.constant 0 : i32
    %c0_i32_1 = arith.constant 0 : i32
    return %c0_i32, %c0_i32_0 : i32, i32
  }
  func.func @transform_2(%arg0: i32) -> (i32, i32, i32) {
    %c0_i32 = arith.constant 0 : i32
    %c0_i32_0 = arith.constant 0 : i32
    %c0_i32_1 = arith.constant 0 : i32
    %c0_i32_2 = arith.constant 0 : i32
    return %c0_i32, %c0_i32_0, %c0_i32_1 : i32, i32, i32
  }
  func.func @transform_3(%arg0: i32) -> (i32, i32) {
    %c0_i32 = arith.constant 0 : i32
    %c0_i32_0 = arith.constant 0 : i32
    %c0_i32_1 = arith.constant 0 : i32
    return %c0_i32, %c0_i32_0 : i32, i32
  }
  func.func @transform_4(%arg0: i32) -> (i32, i32, i32) {
    %c0_i32 = arith.constant 0 : i32
    %c0_i32_0 = arith.constant 0 : i32
    %c0_i32_1 = arith.constant 0 : i32
    %c0_i32_2 = arith.constant 0 : i32
    return %c0_i32, %c0_i32_0, %c0_i32_1 : i32, i32, i32
  }
  func.func @transform_5(%arg0: i32) -> (i32, i32) {
    %c0_i32 = arith.constant 0 : i32
    %c0_i32_0 = arith.constant 0 : i32
    %c0_i32_1 = arith.constant 0 : i32
    return %c0_i32, %c0_i32_0 : i32, i32
  }
  func.func @transform_6(%arg0: i32) -> (i32, i32) {
    %c0_i32 = arith.constant 0 : i32
    %c0_i32_0 = arith.constant 0 : i32
    return %c0_i32, %arg0 : i32, i32
  }
}

</mosaic_0001>

<bundles_post_ra>
// kernel: deep_neural_network_forward.1
= control target key start
LH: loop header
LB: loop body
LE: loop exit
PB: predicated region body
PF: predicated region fallthrough
CT: control target
= control target key end

     0   :  { %s3999_s0 = inlined_call_operand.vmem [shape: f32[1000,2], index: 0, kind: input, shape index: {}]   ;;  %s4000_s1 = inlined_call_operand.vmem [shape: f32[50,2], index: 1, kind: input, shape index: {}]   ;;  %s4001_s2 = inlined_call_operand.vmem [shape: f32[4,50,50], index: 2, kind: input, shape index: {}]   ;;  %s4002_s3 = inlined_call_operand.vmem [shape: f32[1,50], index: 3, kind: input, shape index: {}]   ;;  %s4003_s4 = inlined_call_operand.vmem [shape: f32[5,50,1], index: 4, kind: input, shape index: {}]   ;;  %s4004_s5 = inlined_call_operand.<no memory space> [shape: f32[1,1], index: 5, kind: input, shape index: {}]   ;;  %s4005_s6 = inlined_call_operand.hbm [shape: f32[1,1000], index: 6, kind: output, shape index: {}]  }
   0x1   :  { %v11_v0 = vstv %s4004_s5 }
   0x2   :  { %12 = vst [vmem:[#allocation2] sm:$0x1] %v11_v0 }
   0x3   :  { %13 = vsyncpa [#allocation4], 0 }
   0x4   :  { %15 = vsyncpa [#allocation4 + $0x1], 0  ;;  %s3381_s23 = smov 0   ;;  %s3383_s24 = smov 0  }
   0x5   :  { %s3385_s25 = smov 0   ;;  %s3387_s26 = smov 0  }
   0x6 LB: > { %s2424_s5 = sadd.s32 4294967295, %s3337_s26   ;;  %s2425_s27 = sadd.s32 4294967294, %s3337_s26   ;;  %s3337_s26 = sphi %s3387_s26, %s4013_s26   ;;  %s3333_s25 = sphi %s3385_s25, %s4012_s25   ;;  %s3329_s24 = sphi %s3383_s24, %s4011_s24   ;;  %s3325_s23 = sphi %s3381_s23, %s4010_s23  }
   0x7   : > { %s3404_s28 = sadd.s32 1, %s3337_s26   ;;  %s159_s29 = sadd.s32 1, %s3333_s25 }
   0x8   : > { %s156_s30 = ssub.s32 %s3337_s26, %s3404_s28  ;;  %p169_p0 = scmp.ne.s32.totalorder %s3333_s25, %s3329_s24 }
   0x9   : > { %p157_p1 = scmp.eq.s32.totalorder %s156_s30, 0  ;;  %p170_p2 = scmp.eq.s32.totalorder %s2424_s5, 1 }
   0xa   : > { %p175_p3 = scmp.ne.s32.totalorder %s3329_s24, %s3325_s23  ;;  %p176_p4 = scmp.eq.s32.totalorder %s2425_s27, 1 }
   0xb   : > { %s3414_s7 = scalar_select %p157_p1, %s3333_s25, %s159_s29  }
   0xc   : > { %p3416_p5 = por %p170_p2, %p169_p0  ;;  %p3420_p6 = por %p176_p4, %p175_p3 }
   0xd   : > { %p2428_p7 = scmp.ge.s32.totalorder %s3337_s26, 1  ;;  %p226_p8 = scmp.lt.s32.totalorder %s3337_s26, 3 }
   0xf   : > { %p227_p9 = pnand %p2428_p7, %p226_p8 }
  0x10   : > { %s3426_s10 = sshll.u32 (!%p227_p9), %s2424_s5, 6  ;;  %vm388_vm0 = vcmask (!%p227_p9), 15360   ;;  %v3431_v1 = vld [vmem:[%s4000_s1] sm:$0xff] (!%p227_p9)  ;;  %v3339_v2 = vmov (!%p227_p9), 0   ;;  %v348_v4 = vld [vmem:[%s4003_s4 + $0x10] sm:$0xff] (!%p227_p9)  ;;  %v347_v5 = vld [vmem:[%s4003_s4 + $0x8] sm:$0xff] (!%p227_p9) }
  0x11   : > { %230 = sbr.rel (%p227_p9) target bundleno = 1609 (0x649), region = 44  ;;  %p265_p10 = scmp.lt.s32.totalorder (!%p227_p9), %s3426_s10, 124  ;;  %2675 = vmatprep.mubr.msk.f32.mxu0 (!%p227_p9), %vm388_vm0, %v3431_v1  ;;  %2721 = vmatprep.mubr.msk.f32.mxu1 (!%p227_p9), %vm388_vm0, %v3431_v1  ;;  %v346_v3 = vld [vmem:[%s4003_s4] sm:$0xff] (!%p227_p9)  ;;  %v349_v6 = vld [vmem:[%s4003_s4 + $0x18] sm:$0xff] (!%p227_p9)  ;;  %vm3458_vm1 = vmpackc.low (!%p227_p9), %vm388_vm0, %vm388_vm0  ;;  %vm916_vm2 = vcmask (!%p227_p9), 1041408   ;;  %vm894_vm3 = vcmask (!%p227_p9), 408576  }
  0x12   : > { %2993 = vset.pattern.permute.xlu0 (!%p227_p9), %v3339_v2  ;;  %2994 = vset.pattern.permute.xlu1 (!%p227_p9), %v3339_v2  ;;  %v350_v11 = vld [vmem:[%s4003_s4 + $0x20] sm:$0xff] (!%p227_p9)  ;;  %v352_v27 = vld [vmem:[%s4003_s4 + $0x30] sm:$0x3] (!%p227_p9)  ;;  %v351_v28 = vld [vmem:[%s4003_s4 + $0x28] sm:$0xff] (!%p227_p9)  ;;  %s257_s17 = sand.u32 (!%p227_p9), 1, %s3329_s24   ;;  %s3342_s30 = smov (!%p227_p9), [#allocation3]  }
  0x13   : > { %355 = vperm.xlu0 (!%p227_p9), %2993, %v346_v3   ;;  %365 = vperm.xlu1 (!%p227_p9), %2994, %v348_v4   ;;  %v2510_v38 = vld [vmem:[%s4003_s4 + $0x38] sm:$0xff] (!%p227_p9)  ;;  %v2511_v42 = vld [vmem:[%s4003_s4 + $0x40] sm:$0xff] (!%p227_p9)  ;;  %v2512_v43 = vld [vmem:[%s4003_s4 + $0x48] sm:$0xff] (!%p227_p9)  ;;  %s2429_s18 = sshll.u32 (!%p227_p9), %s257_s17, 2  ;;  %s2352_s5 = scalar_lea.sflag (!%p227_p9), [#allocation4], %s257_s17 }
  0x14   : > { %v2513_v52 = vld [vmem:[%s4003_s4 + $0x50] sm:$0xff] (!%p227_p9)  ;;  %v2514_v54 = vld [vmem:[%s4003_s4 + $0x58] sm:$0xff] (!%p227_p9)  ;;  %v2515_v58 = vld [vmem:[%s4003_s4 + $0x60] sm:$0xff] (!%p227_p9)  ;;  %s259_s19 = scalar_lea.vmem (!%p227_p9), [#allocation3], %s2429_s18  ;;  %s3279_s11 = sshll.u32 (!%p227_p9), %s3342_s30, 4  ;;  %s3280_s11 = int_to_ptr.vmem [resolvable:$false] %s3279_s11 }
  0x15   : > { %v2516_v62 = vld [vmem:[%s4003_s4 + $0x68] sm:$0x3] (!%p227_p9)  ;;  %v341_v7 = vld [vmem:[%s4000_s1 + $0x10] sm:$0xff] (!%p227_p9)  ;;  %s3281_s12 = scalar_lea.vmem (!%p227_p9), %s3280_s11, 128 }
  0x17   : > { %360 = vperm.xlu0 (!%p227_p9), %2993, %v347_v5   ;;  %370 = vperm.xlu1 (!%p227_p9), %2994, %v349_v6   ;;  %v2542_v5 = vld [vmem:[%s4003_s4 + $0x70] sm:$0xff] (!%p227_p9) }
  0x18   : > { %s266_s15 = scalar_select %p265_p10, %s3426_s10, 124 }
  0x1a   : > { %s2431_s20 = sshll.u32 %s266_s15, 3 }
  0x1b   : > { %s3454_s29 = scalar_lea.vmem %s3999_s0, %s2431_s20  ;;  %375 = vperm.xlu0 %2993, %v350_v11   ;;  %380 = vperm.xlu1 %2994, %v351_v28   ;;  %v2548_v28 = vld [vmem:[%s4003_s4 + $0xa0] sm:$0x3]  ;;  %s2366_s20 = sshll.u32 %s259_s19, 4  ;;  %s3959_s20 = int_to_ptr.vmem [resolvable:$true] %s2366_s20 }
  0x1c   : > { %v291_v8 = vld [vmem:[%s3454_s29 + $0x80] sm:$0xff]  ;;  %v292_v9 = vld [vmem:[%s3454_s29 + $0x88] sm:$0xff]  ;;  %v293_v20 = vld [vmem:[%s3454_s29 + $0x90] sm:$0xff]  ;;  %s3275_s27 = scalar_lea.vmem %s3959_s20, 64  ;;  %p3282_p0 = scmp.lt.s32.totalorder %s3959_s20, %s3280_s11 }
  0x1d   : > { %v323_v10 = vld [vmem:[%s3454_s29 + $0x180] sm:$0xff]  ;;  %v2735_v12 = vpack.c.bf16 %v292_v9, %v291_v8  ;;  %v324_v13 = vld [vmem:[%s3454_s29 + $0x188] sm:$0xff]  ;;  %v294_v22 = vld [vmem:[%s3454_s29 + $0x98] sm:$0xff]  ;;  %p3276_p11 = scmp.ne.s32.totalorder %s3959_s20, %s3275_s27  ;;  %p3283_p1 = scmp.lt.s32.totalorder %s3281_s12, %s3275_s27 }
  0x1e   : > { %v275_v14 = vld [vmem:[%s3454_s29] sm:$0xff]  ;;  %v276_v15 = vld [vmem:[%s3454_s29 + $0x8] sm:$0xff]  ;;  %v2783_v16 = vpack.c.bf16 %v324_v13, %v323_v10  ;;  %v325_v23 = vld [vmem:[%s3454_s29 + $0x190] sm:$0xff]  ;;  %v2741_v25 = vpack.c.bf16 %v294_v22, %v293_v20 }
  0x1f   : > { %v2738_v17 = vpack.c.bf16 %v276_v15, %v275_v14  ;;  %v307_v18 = vld [vmem:[%s3454_s29 + $0x100] sm:$0xff]  ;;  %v308_v19 = vld [vmem:[%s3454_s29 + $0x108] sm:$0xff]  ;;  %2737 = vmatprep.subr.msk.bf16.mxu0 %vm3458_vm1, %v2735_v12  ;;  %v326_v24 = vld [vmem:[%s3454_s29 + $0x198] sm:$0xff]  ;;  %385 = vperm.xlu0 %2993, %v352_v27   ;;  %p3277_p12 = pnand %p3276_p11, %p3416_p5  ;;  %p3284_p2 = por %p3283_p1, %p3282_p0 }
  0x20   : > { %v2786_v21 = vpack.c.bf16 %v308_v19, %v307_v18  ;;  %2785 = vmatprep.subr.msk.bf16.mxu1 %vm3458_vm1, %v2783_v16  ;;  %v2789_v26 = vpack.c.bf16 %v326_v24, %v325_v23  ;;  %v277_v29 = vld [vmem:[%s3454_s29 + $0x10] sm:$0xff]  ;;  %v278_v30 = vld [vmem:[%s3454_s29 + $0x18] sm:$0xff]  ;;  %v295_v33 = vld [vmem:[%s3454_s29 + $0xa0] sm:$0xff]  ;;  %861 = vperm.xlu1 %2994, %v2510_v38  }
  0x21   : > { %2740 = vmatpush3.bf16.xpose.msk.msra.mxu0 %vm3458_vm1, %v2738_v17  ;;  %v309_v31 = vld [vmem:[%s3454_s29 + $0x110] sm:$0xff]  ;;  %v310_v32 = vld [vmem:[%s3454_s29 + $0x118] sm:$0xff]  ;;  %v296_v34 = vld [vmem:[%s3454_s29 + $0xa8] sm:$0xff]  ;;  %v2744_v37 = vpack.c.bf16 %v278_v30, %v277_v29  ;;  %p3278_p13 = pneg %p3277_p12 }
  0x22   : > { %2788 = vmatpush3.bf16.xpose.msk.msra.mxu1 %vm3458_vm1, %v2786_v21  ;;  %2743 = vmatprep.subr.msk.bf16.mxu0 %vm3458_vm1, %v2741_v25  ;;  %v327_v35 = vld [vmem:[%s3454_s29 + $0x1a0] sm:$0xff]  ;;  %v328_v36 = vld [vmem:[%s3454_s29 + $0x1a8] sm:$0xff]  ;;  %v2792_v39 = vpack.c.bf16 %v310_v32, %v309_v31  ;;  %v2747_v40 = vpack.c.bf16 %v296_v34, %v295_v33  ;;  %v297_v48 = vld [vmem:[%s3454_s29 + $0xb0] sm:$0xff] }
  0x23   : > { %2791 = vmatprep.subr.msk.bf16.mxu1 %vm3458_vm1, %v2789_v26  ;;  %v2795_v41 = vpack.c.bf16 %v328_v36, %v327_v35  ;;  %v279_v44 = vld [vmem:[%s3454_s29 + $0x20] sm:$0xff]  ;;  %v280_v45 = vld [vmem:[%s3454_s29 + $0x28] sm:$0xff]  ;;  %v298_v49 = vld [vmem:[%s3454_s29 + $0xb8] sm:$0xff]  ;;  %866 = vperm.xlu0 %2993, %v2511_v42   ;;  %p3285_p3 = pnand %p3284_p2, %p3278_p13 }
  0x24   : > { %v311_v46 = vld [vmem:[%s3454_s29 + $0x120] sm:$0xff]  ;;  %v312_v47 = vld [vmem:[%s3454_s29 + $0x128] sm:$0xff]  ;;  %v329_v50 = vld [vmem:[%s3454_s29 + $0x1b0] sm:$0xff]  ;;  %871 = vperm.xlu1 %2994, %v2512_v43   ;;  %v2750_v53 = vpack.c.bf16 %v280_v45, %v279_v44  ;;  %v2753_v56 = vpack.c.bf16 %v298_v49, %v297_v48 }
  0x25   : > { %v330_v51 = vld [vmem:[%s3454_s29 + $0x1b8] sm:$0xff]  ;;  %v2798_v55 = vpack.c.bf16 %v312_v47, %v311_v46  ;;  %v281_v59 = vld [vmem:[%s3454_s29 + $0x30] sm:$0xff]  ;;  %v299_v0 = vld [vmem:[%s3454_s29 + $0xc0] sm:$0xff] }
  0x26   : > { %v2801_v57 = vpack.c.bf16 %v330_v51, %v329_v50  ;;  %v282_v60 = vld [vmem:[%s3454_s29 + $0x38] sm:$0xff]  ;;  %v313_v61 = vld [vmem:[%s3454_s29 + $0x130] sm:$0xff]  ;;  %v300_v2 = vld [vmem:[%s3454_s29 + $0xc8] sm:$0xff] }
  0x27   : > { %876 = vperm.xlu0 %2993, %v2513_v52   ;;  %v314_v63 = vld [vmem:[%s3454_s29 + $0x138] sm:$0xff]  ;;  %v331_v3 = vld [vmem:[%s3454_s29 + $0x1c0] sm:$0xff]  ;;  %v332_v4 = vld [vmem:[%s3454_s29 + $0x1c8] sm:$0xff]  ;;  %v2756_v6 = vpack.c.bf16 %v282_v60, %v281_v59  ;;  %v2759_v10 = vpack.c.bf16 %v300_v2, %v299_v0 }
  0x28   : > { %881 = vperm.xlu1 %2994, %v2514_v54   ;;  %v2543_v8 = vld [vmem:[%s4003_s4 + $0x78] sm:$0xff]  ;;  %v2804_v9 = vpack.c.bf16 %v314_v63, %v313_v61  ;;  %v2807_v11 = vpack.c.bf16 %v332_v4, %v331_v3  ;;  %v2544_v12 = vld [vmem:[%s4003_s4 + $0x80] sm:$0xff]  ;;  %v2545_v13 = vld [vmem:[%s4003_s4 + $0x88] sm:$0xff] }
  0x29   : > { %2746 = vmatpush3.bf16.xpose.msk.msra.mxu0 %vm3458_vm1, %v2744_v37  ;;  %v283_v14 = vld [vmem:[%s3454_s29 + $0x40] sm:$0xff]  ;;  %v284_v15 = vld [vmem:[%s3454_s29 + $0x48] sm:$0xff]  ;;  %v301_v18 = vld [vmem:[%s3454_s29 + $0xd0] sm:$0xff] }
  0x2a   : > { %2794 = vmatpush3.bf16.xpose.msk.msra.mxu1 %vm3458_vm1, %v2792_v39  ;;  %2749 = vmatprep.subr.msk.bf16.mxu0 %vm3458_vm1, %v2747_v40  ;;  %v315_v16 = vld [vmem:[%s3454_s29 + $0x140] sm:$0xff]  ;;  %v316_v17 = vld [vmem:[%s3454_s29 + $0x148] sm:$0xff]  ;;  %v302_v19 = vld [vmem:[%s3454_s29 + $0xd8] sm:$0xff]  ;;  %v2762_v23 = vpack.c.bf16 %v284_v15, %v283_v14 }
  0x2b   : > { %2797 = vmatprep.subr.msk.bf16.mxu1 %vm3458_vm1, %v2795_v41  ;;  %886 = vperm.xlu0 %2993, %v2515_v58   ;;  %v333_v20 = vld [vmem:[%s3454_s29 + $0x1d0] sm:$0xff]  ;;  %v334_v21 = vld [vmem:[%s3454_s29 + $0x1d8] sm:$0xff]  ;;  %v2810_v25 = vpack.c.bf16 %v316_v17, %v315_v16  ;;  %v2765_v26 = vpack.c.bf16 %v302_v19, %v301_v18  ;;  %v2574_v29 = vld [vmem:[%s4003_s4 + $0xa8] sm:$0xff]  ;;  %v3340_v16 = vmov 0.0  }
  0x2c   : > { %891 = vperm.xlu1 %2994, %v2516_v62   ;;  %v2546_v22 = vld [vmem:[%s4003_s4 + $0x90] sm:$0xff]  ;;  %v2547_v24 = vld [vmem:[%s4003_s4 + $0x98] sm:$0xff]  ;;  %v2813_v27 = vpack.c.bf16 %v334_v21, %v333_v20  ;;  %v303_v34 = vld [vmem:[%s3454_s29 + $0xe0] sm:$0xff] }
  0x2d   : > { %v285_v30 = vld [vmem:[%s3454_s29 + $0x50] sm:$0xff]  ;;  %v286_v31 = vld [vmem:[%s3454_s29 + $0x58] sm:$0xff]  ;;  %v304_v35 = vld [vmem:[%s3454_s29 + $0xe8] sm:$0xff] }
  0x2e   : > { %v317_v32 = vld [vmem:[%s3454_s29 + $0x150] sm:$0xff]  ;;  %v318_v33 = vld [vmem:[%s3454_s29 + $0x158] sm:$0xff]  ;;  %v335_v36 = vld [vmem:[%s3454_s29 + $0x1e0] sm:$0xff]  ;;  %v2768_v39 = vpack.c.bf16 %v286_v31, %v285_v30  ;;  %v2771_v42 = vpack.c.bf16 %v304_v35, %v303_v34 }
  0x2f   : > { %1189 = vperm.xlu0 %2993, %v2542_v5   ;;  %v336_v37 = vld [vmem:[%s3454_s29 + $0x1e8] sm:$0xff]  ;;  %v2575_v38 = vld [vmem:[%s4003_s4 + $0xb0] sm:$0xff]  ;;  %v2576_v40 = vld [vmem:[%s4003_s4 + $0xb8] sm:$0xff]  ;;  %v2816_v41 = vpack.c.bf16 %v318_v33, %v317_v32 }
  0x30   : > { %1194 = vperm.xlu1 %2994, %v2543_v8   ;;  %v2819_v43 = vpack.c.bf16 %v336_v37, %v335_v36  ;;  %v2577_v44 = vld [vmem:[%s4003_s4 + $0xc0] sm:$0xff]  ;;  %v2578_v45 = vld [vmem:[%s4003_s4 + $0xc8] sm:$0xff]  ;;  %v305_v50 = vld [vmem:[%s3454_s29 + $0xf0] sm:$0xff] }
  0x31   : > { %2752 = vmatpush3.bf16.xpose.msk.msra.mxu0 %vm3458_vm1, %v2750_v53  ;;  %v287_v46 = vld [vmem:[%s3454_s29 + $0x60] sm:$0xff]  ;;  %v288_v47 = vld [vmem:[%s3454_s29 + $0x68] sm:$0xff]  ;;  %v306_v51 = vld [vmem:[%s3454_s29 + $0xf8] sm:$0xff] }
  0x32   : > { %2800 = vmatpush3.bf16.xpose.msk.msra.mxu1 %vm3458_vm1, %v2798_v55  ;;  %2755 = vmatprep.subr.msk.bf16.mxu0 %vm3458_vm1, %v2753_v56  ;;  %v319_v48 = vld [vmem:[%s3454_s29 + $0x160] sm:$0xff]  ;;  %v320_v49 = vld [vmem:[%s3454_s29 + $0x168] sm:$0xff]  ;;  %v337_v52 = vld [vmem:[%s3454_s29 + $0x1f0] sm:$0xff]  ;;  %v2774_v55 = vpack.c.bf16 %v288_v47, %v287_v46  ;;  %v2777_v58 = vpack.c.bf16 %v306_v51, %v305_v50 }
  0x33   : > { %2803 = vmatprep.subr.msk.bf16.mxu1 %vm3458_vm1, %v2801_v57  ;;  %1199 = vperm.xlu0 %2993, %v2544_v12   ;;  %v338_v53 = vld [vmem:[%s3454_s29 + $0x1f8] sm:$0xff]  ;;  %v2579_v54 = vld [vmem:[%s4003_s4 + $0xd0] sm:$0xff]  ;;  %v2822_v57 = vpack.c.bf16 %v320_v49, %v319_v48  ;;  %v2606_v60 = vld [vmem:[%s4003_s4 + $0xe0] sm:$0xff] }
  0x34   : > { %1204 = vperm.xlu1 %2994, %v2545_v13   ;;  %v2580_v56 = vld [vmem:[%s4003_s4 + $0xd8] sm:$0x3]  ;;  %v2825_v59 = vpack.c.bf16 %v338_v53, %v337_v52  ;;  %v2607_v61 = vld [vmem:[%s4003_s4 + $0xe8] sm:$0xff]  ;;  %v289_v62 = vld [vmem:[%s3454_s29 + $0x70] sm:$0xff] }
  0x35   : > { %v290_v63 = vld [vmem:[%s3454_s29 + $0x78] sm:$0xff]  ;;  %v321_v0 = vld [vmem:[%s3454_s29 + $0x170] sm:$0xff]  ;;  %v2610_v8 = vld [vmem:[%s4003_s4 + $0x100] sm:$0xff] }
  0x36   : > { %v322_v2 = vld [vmem:[%s3454_s29 + $0x178] sm:$0xff]  ;;  %v2608_v3 = vld [vmem:[%s4003_s4 + $0xf0] sm:$0xff]  ;;  %v2780_v4 = vpack.c.bf16 %v290_v63, %v289_v62  ;;  %v340_v12 = vld [vmem:[%s4000_s1 + $0x8] sm:$0xff]  ;;  %s3957_s29 = scalar_lea.hbm %s4005_s6, %s3426_s10 }
  0x37   : > { %1209 = vperm.xlu0 %2993, %v2546_v22   ;;  %v2609_v5 = vld [vmem:[%s4003_s4 + $0xf8] sm:$0xff]  ;;  %v343_v13 = vld [vmem:[%s4000_s1 + $0x20] sm:$0xff]  ;;  %v344_v14 = vld [vmem:[%s4000_s1 + $0x28] sm:$0xff] }
  0x38   : > { %1214 = vperm.xlu1 %2994, %v2547_v24   ;;  %v345_v15 = vld [vmem:[%s4000_s1 + $0x30] sm:$0x3] }
  0x39   : > { %2758 = vmatpush3.bf16.xpose.msk.msra.mxu0 %vm3458_vm1, %v2756_v6  ;;  %v2828_v6 = vpack.c.bf16 %v322_v2, %v321_v0 }
  0x3a   : > { %2806 = vmatpush3.bf16.xpose.msk.msra.mxu1 %vm3458_vm1, %v2804_v9  ;;  %2761 = vmatprep.subr.msk.bf16.mxu0 %vm3458_vm1, %v2759_v10  ;;  %v2611_v9 = vld [vmem:[%s4003_s4 + $0x108] sm:$0xff]  ;;  %v2612_v10 = vld [vmem:[%s4003_s4 + $0x110] sm:$0x3] }
  0x3b   : > { %2809 = vmatprep.subr.msk.bf16.mxu1 %vm3458_vm1, %v2807_v11  ;;  %1219 = vperm.xlu0 %2993, %v2548_v28   ;;  %v2150_v11 = vld [vmem:[#allocation2] sm:$0x1] }
  0x3c   : > { %1515 = vperm.xlu1 %2994, %v2574_v29  }
  0x3f   : > { %1520 = vperm.xlu0 %2993, %v2575_v38  }
  0x40   : > { %1525 = vperm.xlu1 %2994, %v2576_v40  }
  0x41   : > { %2764 = vmatpush3.bf16.xpose.msk.msra.mxu0 %vm3458_vm1, %v2762_v23 }
  0x42   : > { %2812 = vmatpush3.bf16.xpose.msk.msra.mxu1 %vm3458_vm1, %v2810_v25  ;;  %2767 = vmatprep.subr.msk.bf16.mxu0 %vm3458_vm1, %v2765_v26 }
  0x43   : > { %2815 = vmatprep.subr.msk.bf16.mxu1 %vm3458_vm1, %v2813_v27  ;;  %1530 = vperm.xlu0 %2993, %v2577_v44  }
  0x44   : > { %1535 = vperm.xlu1 %2994, %v2578_v45  }
  0x47   : > { %1540 = vperm.xlu0 %2993, %v2579_v54  }
  0x48   : > { %1545 = vperm.xlu1 %2994, %v2580_v56  }
  0x49   : > { %2770 = vmatpush3.bf16.xpose.msk.msra.mxu0 %vm3458_vm1, %v2768_v39 }
  0x4a   : > { %2818 = vmatpush3.bf16.xpose.msk.msra.mxu1 %vm3458_vm1, %v2816_v41  ;;  %2773 = vmatprep.subr.msk.bf16.mxu0 %vm3458_vm1, %v2771_v42 }
  0x4b   : > { %2821 = vmatprep.subr.msk.bf16.mxu1 %vm3458_vm1, %v2819_v43  ;;  %1841 = vperm.xlu0 %2993, %v2606_v60  }
  0x4c   : > { %1846 = vperm.xlu1 %2994, %v2607_v61  }
  0x4f   : > { %1851 = vperm.xlu0 %2993, %v2608_v3  }
  0x50   : > { %1856 = vperm.xlu1 %2994, %v2609_v5  }
  0x51   : > { %2776 = vmatpush3.bf16.xpose.msk.msra.mxu0 %vm3458_vm1, %v2774_v55 }
  0x52   : > { %2824 = vmatpush3.bf16.xpose.msk.msra.mxu1 %vm3458_vm1, %v2822_v57  ;;  %2779 = vmatprep.subr.msk.bf16.mxu0 %vm3458_vm1, %v2777_v58 }
  0x53   : > { %2827 = vmatprep.subr.msk.bf16.mxu1 %vm3458_vm1, %v2825_v59  ;;  %1861 = vperm.xlu0 %2993, %v2610_v8  }
  0x54   : > { %1866 = vperm.xlu1 %2994, %v2611_v9  }
  0x57   : > { %1871 = vperm.xlu0 %2993, %v2612_v10  }
  0x58   : > { %2153 = vperm.xlu1 %2994, %v2150_v11  }
  0x59   : > { %2782 = vmatpush3.bf16.xpose.msk.msra.mxu0 %vm3458_vm1, %v2780_v4 }
  0x5a   : > { %2830 = vmatpush3.bf16.xpose.msk.msra.mxu1 %vm3458_vm1, %v2828_v6 }
  0x60   : > { %2676 = vmatmul.mubr.msk.f32.vlgmr.msra.gmra.mrb[0].mxu0 %vm388_vm0, %v3431_v1 }
  0x61   : > { %2722 = vmatmul.mubr.msk.f32.vlgmr.msra.gmra.mrb[0].mxu1 %vm388_vm0, %v3431_v1  ;;  %2677 = vmatprep.mubr.msk.f32.mxu0 %vm388_vm0, %v340_v12  ;;  %v342_v1 = vld [vmem:[%s4000_s1 + $0x18] sm:$0xff] }
  0x62   : > { %2723 = vmatprep.mubr.msk.f32.mxu1 %vm388_vm0, %v340_v12 }
  0x64   : > { %2678 = vmatmul.mubr.msk.f32.gmra.mrb[2].mxu0 %vm388_vm0, %v340_v12 }
  0x65   : > { %2724 = vmatmul.mubr.msk.f32.gmra.mrb[2].mxu1 %vm388_vm0, %v340_v12  ;;  %2679 = vmatprep.mubr.msk.f32.mxu0 %vm388_vm0, %v341_v7 }
  0x66   : > { %2725 = vmatprep.mubr.msk.f32.mxu1 %vm388_vm0, %v341_v7 }
  0x68   : > { %2680 = vmatmul.mubr.msk.f32.gmra.mrb[4].mxu0 %vm388_vm0, %v341_v7 }
  0x69   : > { %2726 = vmatmul.mubr.msk.f32.gmra.mrb[4].mxu1 %vm388_vm0, %v341_v7  ;;  %2681 = vmatprep.mubr.msk.f32.mxu0 %vm388_vm0, %v342_v1 }
  0x6a   : > { %2727 = vmatprep.mubr.msk.f32.mxu1 %vm388_vm0, %v342_v1 }
  0x6c   : > { %2682 = vmatmul.mubr.msk.f32.gmra.mrb[6].mxu0 %vm388_vm0, %v342_v1 }
  0x6d   : > { %2728 = vmatmul.mubr.msk.f32.gmra.mrb[6].mxu1 %vm388_vm0, %v342_v1  ;;  %2683 = vmatprep.mubr.msk.f32.mxu0 %vm388_vm0, %v343_v13 }
  0x6e   : > { %2729 = vmatprep.mubr.msk.f32.mxu1 %vm388_vm0, %v343_v13 }
  0x70   : > { %2684 = vmatmul.mubr.msk.f32.gmra.mrb[8].mxu0 %vm388_vm0, %v343_v13 }
  0x71   : > { %2730 = vmatmul.mubr.msk.f32.gmra.mrb[8].mxu1 %vm388_vm0, %v343_v13  ;;  %2685 = vmatprep.mubr.msk.f32.mxu0 %vm388_vm0, %v344_v14 }
  0x72   : > { %2731 = vmatprep.mubr.msk.f32.mxu1 %vm388_vm0, %v344_v14 }
  0x74   : > { %2686 = vmatmul.mubr.msk.f32.gmra.mrb[10].mxu0 %vm388_vm0, %v344_v14 }
  0x75   : > { %2732 = vmatmul.mubr.msk.f32.gmra.mrb[10].mxu1 %vm388_vm0, %v344_v14  ;;  %2687 = vmatprep.mubr.msk.f32.mxu0 %vm388_vm0, %v345_v15 }
  0x76   : > { %2733 = vmatprep.mubr.msk.f32.mxu1 %vm388_vm0, %v345_v15 }
  0x78   : > { %2688 = vmatmul.mubr.msk.f32.gmra.mrb[12].mxu0 %vm388_vm0, %v345_v15 }
  0x79   : > { %2734 = vmatmul.mubr.msk.f32.gmra.mrb[12].mxu1 %vm388_vm0, %v345_v15  ;;  %993 = vmatprep.mubr.f32.mxu0 %v3340_v16 }
  0x7a   : > { %1100 = vmatprep.mubr.f32.mxu1 %v3340_v16 }
  0x92   : > { %v356_v17 = vpop.permute.xlu0 %355  ;;  %v366_v31 = vpop.permute.xlu1 %365 }
  0x96   : > { %v361_v26 = vpop.permute.xlu0 %360  ;;  %v371_v44 = vpop.permute.xlu1 %370 }
  0x9a   : > { %v376_v57 = vpop.permute.xlu0 %375  ;;  %v381_v10 = vpop.permute.xlu1 %380 }
 0x133   : > { %v668_v18 = vpop.f32.mrb[0].mxu0 }
 0x134   : > { %v669_v19 = vadd.f32 %v668_v18, %v356_v17  ;;  %v775_v20 = vpop.f32.mrb[0].mxu1  ;;  %v670_v21 = vpop.f32.mrb[1].mxu0 }
 0x135   : > { %v776_v22 = vadd.f32 %v775_v20, %v356_v17  ;;  %v671_v23 = vadd.f32 %v670_v21, %v356_v17  ;;  %v777_v24 = vpop.f32.mrb[1].mxu1 }
 0x136   : > { %2995 = vtanh.f32 %v669_v19  ;;  %v778_v25 = vadd.f32 %v777_v24, %v356_v17  ;;  %v386_v24 = vpop.permute.xlu0 %385 }
 0x137   : > { %2997 = vtanh.f32 %v776_v22  ;;  %v674_v27 = vpop.f32.mrb[2].mxu0 }
 0x138   : > { %2999 = vtanh.f32 %v671_v23  ;;  %v675_v28 = vadd.f32 %v674_v27, %v361_v26  ;;  %v781_v29 = vpop.f32.mrb[2].mxu1  ;;  %v676_v30 = vpop.f32.mrb[3].mxu0 }
 0x139   : > { %3001 = vtanh.f32 %v778_v25  ;;  %v782_v32 = vadd.f32 %v781_v29, %v361_v26  ;;  %v677_v33 = vadd.f32 %v676_v30, %v361_v26  ;;  %v783_v34 = vpop.f32.mrb[3].mxu1 }
 0x13a   : > { %3003 = vtanh.f32 %v675_v28  ;;  %v784_v35 = vadd.f32 %v783_v34, %v361_v26 }
 0x13b   : > { %3005 = vtanh.f32 %v782_v32  ;;  %v680_v36 = vpop.f32.mrb[4].mxu0 }
 0x13c   : > { %3007 = vtanh.f32 %v677_v33  ;;  %v681_v37 = vadd.f32 %v680_v36, %v366_v31  ;;  %v787_v38 = vpop.f32.mrb[4].mxu1  ;;  %v682_v39 = vpop.f32.mrb[5].mxu0 }
 0x13d   : > { %3009 = vtanh.f32 %v784_v35  ;;  %v788_v40 = vadd.f32 %v787_v38, %v366_v31  ;;  %v683_v41 = vadd.f32 %v682_v39, %v366_v31  ;;  %v789_v42 = vpop.f32.mrb[5].mxu1 }
 0x13e   : > { %3011 = vtanh.f32 %v681_v37  ;;  %v790_v43 = vadd.f32 %v789_v42, %v366_v31 }
 0x13f   : > { %3013 = vtanh.f32 %v788_v40  ;;  %v686_v45 = vpop.f32.mrb[6].mxu0 }
 0x140   : > { %v2996_v46 = vpop.eup %2995  ;;  %3015 = vtanh.f32 %v683_v41  ;;  %v687_v47 = vadd.f32 %v686_v45, %v371_v44  ;;  %v793_v48 = vpop.f32.mrb[6].mxu1 }
 0x141   : > { %v688_v49 = vpop.f32.mrb[7].mxu0  ;;  %v2998_v50 = vpop.eup %2997  ;;  %3017 = vtanh.f32 %v790_v43  ;;  %v794_v51 = vadd.f32 %v793_v48, %v371_v44 }
 0x142   : > { %v689_v52 = vadd.f32 %v688_v49, %v371_v44  ;;  %v795_v53 = vpop.f32.mrb[7].mxu1  ;;  %v3000_v54 = vpop.eup %2999  ;;  %3019 = vtanh.f32 %v687_v47 }
 0x143   : > { %v796_v55 = vadd.f32 %v795_v53, %v371_v44  ;;  %v3002_v56 = vpop.eup %3001  ;;  %3021 = vtanh.f32 %v794_v51  ;;  %v692_v58 = vpop.f32.mrb[8].mxu0 }
 0x144   : > { %v3004_v59 = vpop.eup %3003  ;;  %3023 = vtanh.f32 %v689_v52  ;;  %v693_v60 = vadd.f32 %v692_v58, %v376_v57  ;;  %v799_v61 = vpop.f32.mrb[8].mxu1  ;;  %v845_v58 = vld [vmem:[%s4001_s2 + $0x8] sm:$0xff] }
 0x145   : > { %v694_v62 = vpop.f32.mrb[9].mxu0  ;;  %v3006_v63 = vpop.eup %3005  ;;  %3025 = vtanh.f32 %v796_v55  ;;  %v800_v0 = vadd.f32 %v799_v61, %v376_v57  ;;  %v2833_v4 = vpack.c.bf16 %v3004_v59, %v2996_v46  ;;  %v844_v55 = vld [vmem:[%s4001_s2] sm:$0xff]  ;;  %v846_v59 = vld [vmem:[%s4001_s2 + $0x10] sm:$0xff] }
 0x146   : > { %v695_v2 = vadd.f32 %v694_v62, %v376_v57  ;;  %v801_v3 = vpop.f32.mrb[9].mxu1  ;;  %v3008_v5 = vpop.eup %3007  ;;  %3027 = vtanh.f32 %v693_v60  ;;  %v2845_v8 = vpack.c.bf16 %v3006_v63, %v2998_v50  ;;  %v847_v60 = vld [vmem:[%s4001_s2 + $0x18] sm:$0xff]  ;;  %v848_v61 = vld [vmem:[%s4001_s2 + $0x20] sm:$0xff]  ;;  %v849_v62 = vld [vmem:[%s4001_s2 + $0x28] sm:$0xff] }
 0x147   : > { %v802_v6 = vadd.f32 %v801_v3, %v376_v57  ;;  %v3010_v9 = vpop.eup %3009  ;;  %3029 = vtanh.f32 %v800_v0  ;;  %v698_v11 = vpop.f32.mrb[10].mxu0  ;;  %v2831_v12 = vpack.c.bf16 %v3008_v5, %v3000_v54  ;;  %v850_v63 = vld [vmem:[%s4001_s2 + $0x30] sm:$0x3] }
 0x148   : > { %v3012_v7 = vpop.eup %3011  ;;  %3031 = vtanh.f32 %v695_v2  ;;  %v699_v1 = vadd.f32 %v698_v11, %v381_v10  ;;  %v805_v13 = vpop.f32.mrb[10].mxu1  ;;  %v2843_v15 = vpack.c.bf16 %v3010_v9, %v3002_v56 }
 0x149   : > { %v700_v14 = vpop.f32.mrb[11].mxu0  ;;  %v3014_v17 = vpop.eup %3013  ;;  %3033 = vtanh.f32 %v802_v6  ;;  %v806_v18 = vadd.f32 %v805_v13, %v381_v10  ;;  %2832 = vmatprep.subr.bf16.mxu0 %v2831_v12 }
 0x14a   : > { %v701_v19 = vadd.f32 %v700_v14, %v381_v10  ;;  %v807_v20 = vpop.f32.mrb[11].mxu1  ;;  %v3016_v21 = vpop.eup %3015  ;;  %3035 = vtanh.f32 %v699_v1  ;;  %2844 = vmatprep.subr.bf16.mxu1 %v2843_v15  ;;  %2834 = vmatpush1.bf16.msra.mxu0 %v2833_v4 }
 0x14b   : > { %v808_v22 = vadd.f32 %v807_v20, %v381_v10  ;;  %v3018_v23 = vpop.eup %3017  ;;  %3037 = vtanh.f32 %v806_v18  ;;  %2846 = vmatpush1.bf16.msra.mxu1 %v2845_v8  ;;  %v704_v25 = vpop.f32.mrb[12].mxu0 }
 0x14c   : > { %v3020_v26 = vpop.eup %3019  ;;  %3039 = vtanh.f32 %v701_v19  ;;  %v811_v27 = vpop.f32.mrb[12].mxu1  ;;  %v705_v37 = vadd.f32 %v704_v25, %v386_v24 }
 0x14d   : > { %v706_v28 = vpop.f32.mrb[13].mxu0  ;;  %v3022_v29 = vpop.eup %3021  ;;  %3041 = vtanh.f32 %v808_v22  ;;  %v2837_v32 = vpack.c.bf16 %v3020_v26, %v3012_v7  ;;  %v812_v40 = vadd.f32 %v811_v27, %v386_v24 }
 0x14e   : > { %v707_v30 = vadd.f32 %v706_v28, %v386_v24  ;;  %v813_v31 = vpop.f32.mrb[13].mxu1  ;;  %v3024_v33 = vpop.eup %3023  ;;  %v2849_v35 = vpack.c.bf16 %v3022_v29, %v3014_v17 }
 0x14f   : > { %v814_v34 = vadd.f32 %v813_v31, %v386_v24  ;;  %v3026_v36 = vpop.eup %3025  ;;  %v2835_v38 = vpack.c.bf16 %v3024_v33, %v3016_v21  ;;  %v862_v0 = vpop.permute.xlu1 %861 }
 0x150   : > { %v3028_v39 = vpop.eup %3027  ;;  %3043 = vtanh.f32 %v707_v30  ;;  %v2847_v41 = vpack.c.bf16 %v3026_v36, %v3018_v23  ;;  %v867_v11 = vpop.permute.xlu0 %866 }
 0x151   : > { %v3030_v42 = vpop.eup %3029  ;;  %3045 = vtanh.f32 %v814_v34  ;;  %2836 = vmatprep.subr.bf16.mxu0 %v2835_v38 }
 0x152   : > { %v3032_v43 = vpop.eup %3031  ;;  %2848 = vmatprep.subr.bf16.mxu1 %v2847_v41  ;;  %2838 = vmatpush1.bf16.msra.mxu0 %v2837_v32  ;;  %3047 = vtanh.f32 %v705_v37 }
 0x153   : > { %v3034_v44 = vpop.eup %3033  ;;  %2850 = vmatpush1.bf16.msra.mxu1 %v2849_v35  ;;  %3049 = vtanh.f32 %v812_v40  ;;  %v872_v19 = vpop.permute.xlu1 %871 }
 0x154   : > { %v3036_v45 = vpop.eup %3035  ;;  %v877_v28 = vpop.permute.xlu0 %876 }
 0x155   : > { %v3038_v46 = vpop.eup %3037  ;;  %v2841_v47 = vpack.c.bf16 %v3036_v45, %v3028_v39 }
 0x156   : > { %v3040_v48 = vpop.eup %3039  ;;  %v2853_v49 = vpack.c.bf16 %v3038_v46, %v3030_v42 }
 0x157   : > { %v3042_v50 = vpop.eup %3041  ;;  %v2839_v51 = vpack.c.bf16 %v3040_v48, %v3032_v43  ;;  %v882_v41 = vpop.permute.xlu1 %881 }
 0x158   : > { %v2851_v52 = vpack.c.bf16 %v3042_v50, %v3034_v44 }
 0x159   : > { %2840 = vmatprep.subr.bf16.mxu0 %v2839_v51 }
 0x15a   : > { %v3044_v53 = vpop.eup %3043  ;;  %2852 = vmatprep.subr.bf16.mxu1 %v2851_v52  ;;  %2842 = vmatpush1.bf16.msra.mxu0 %v2841_v47 }
 0x15b   : > { %v3046_v54 = vpop.eup %3045  ;;  %2854 = vmatpush1.bf16.msra.mxu1 %v2853_v49  ;;  %2517 = vmatprep.subr.msk.mxu0 %vm916_vm2, %v3044_v53 }
 0x15c   : > { %2526 = vmatprep.subr.msk.mxu1 %vm916_vm2, %v3046_v54  ;;  %v3048_v56 = vpop.eup %3047 }
 0x15d   : > { %v3050_v57 = vpop.eup %3049 }
 0x15e   : > { %2518 = vmatpush1.msk.msra.mxu0 %vm916_vm2, %v3048_v56  ;;  %v887_v56 = vpop.permute.xlu0 %886 }
 0x15f   : > { %2527 = vmatpush1.msk.msra.mxu1 %vm916_vm2, %v3050_v57  ;;  %2519 = vmatmul.mubr.msk.f32.vlgmr.msra.gmra.mrb[14].mxu0 %vm894_vm3, %v844_v55 }
 0x160   : > { %2528 = vmatmul.mubr.msk.f32.vlgmr.msra.gmra.mrb[14].mxu1 %vm894_vm3, %v844_v55  ;;  %999 = vmatprep.mubr.f32.mxu0 %v3340_v16 }
 0x161   : > { %1106 = vmatprep.mubr.f32.mxu1 %v3340_v16 }
 0x163   : > { %2520 = vmatmul.mubr.msk.f32.gmra.mrb[16].mxu0 %vm894_vm3, %v845_v58 }
 0x164   : > { %2529 = vmatmul.mubr.msk.f32.gmra.mrb[16].mxu1 %vm894_vm3, %v845_v58  ;;  %1005 = vmatprep.mubr.f32.mxu0 %v3340_v16 }
 0x165   : > { %1112 = vmatprep.mubr.f32.mxu1 %v3340_v16 }
 0x167   : > { %2521 = vmatmul.mubr.msk.f32.gmra.mrb[18].mxu0 %vm894_vm3, %v846_v59 }
 0x168   : > { %2530 = vmatmul.mubr.msk.f32.gmra.mrb[18].mxu1 %vm894_vm3, %v846_v59  ;;  %1011 = vmatprep.mubr.f32.mxu0 %v3340_v16 }
 0x169   : > { %1118 = vmatprep.mubr.f32.mxu1 %v3340_v16 }
 0x16b   : > { %2522 = vmatmul.mubr.msk.f32.gmra.mrb[20].mxu0 %vm894_vm3, %v847_v60 }
 0x16c   : > { %2531 = vmatmul.mubr.msk.f32.gmra.mrb[20].mxu1 %vm894_vm3, %v847_v60  ;;  %1017 = vmatprep.mubr.f32.mxu0 %v3340_v16 }
 0x16d   : > { %1124 = vmatprep.mubr.f32.mxu1 %v3340_v16 }
 0x16f   : > { %2523 = vmatmul.mubr.msk.f32.gmra.mrb[22].mxu0 %vm894_vm3, %v848_v61 }
 0x170   : > { %2532 = vmatmul.mubr.msk.f32.gmra.mrb[22].mxu1 %vm894_vm3, %v848_v61  ;;  %1023 = vmatprep.mubr.f32.mxu0 %v3340_v16 }
 0x171   : > { %1130 = vmatprep.mubr.f32.mxu1 %v3340_v16 }
 0x173   : > { %2524 = vmatmul.mubr.msk.f32.gmra.mrb[24].mxu0 %vm894_vm3, %v849_v62 }
 0x174   : > { %2533 = vmatmul.mubr.msk.f32.gmra.mrb[24].mxu1 %vm894_vm3, %v849_v62  ;;  %1029 = vmatprep.mubr.f32.mxu0 %v3340_v16 }
 0x175   : > { %1136 = vmatprep.mubr.f32.mxu1 %v3340_v16 }
 0x177   : > { %2525 = vmatmul.mubr.msk.f32.gmra.mrb[26].mxu0 %vm894_vm3, %v850_v63 }
 0x178   : > { %2534 = vmatmul.mubr.msk.f32.gmra.mrb[26].mxu1 %vm894_vm3, %v850_v63  ;;  %1319 = vmatprep.mubr.f32.mxu0 %v3340_v16 }
 0x179   : > { %1426 = vmatprep.mubr.f32.mxu1 %v3340_v16 }
 0x232   : > { %v995_v2 = vpop.f32.mrb[14].mxu0 }
 0x233   : > { %v996_v3 = vadd.f32 %v995_v2, %v862_v0  ;;  %v1102_v4 = vpop.f32.mrb[14].mxu1  ;;  %v997_v5 = vpop.f32.mrb[15].mxu0 }
 0x234   : > { %v1103_v6 = vadd.f32 %v1102_v4, %v862_v0  ;;  %v998_v8 = vadd.f32 %v997_v5, %v862_v0  ;;  %v1104_v9 = vpop.f32.mrb[15].mxu1 }
 0x235   : > { %3051 = vtanh.f32 %v996_v3  ;;  %v1105_v10 = vadd.f32 %v1104_v9, %v862_v0  ;;  %v892_v9 = vpop.permute.xlu1 %891 }
 0x236   : > { %3053 = vtanh.f32 %v1103_v6  ;;  %v1001_v12 = vpop.f32.mrb[16].mxu0 }
 0x237   : > { %3055 = vtanh.f32 %v998_v8  ;;  %v1002_v7 = vadd.f32 %v1001_v12, %v867_v11  ;;  %v1108_v1 = vpop.f32.mrb[16].mxu1  ;;  %v1003_v13 = vpop.f32.mrb[17].mxu0 }
 0x238   : > { %3057 = vtanh.f32 %v1105_v10  ;;  %v1109_v14 = vadd.f32 %v1108_v1, %v867_v11  ;;  %v1004_v15 = vadd.f32 %v1003_v13, %v867_v11  ;;  %v1110_v17 = vpop.f32.mrb[17].mxu1 }
 0x239   : > { %3059 = vtanh.f32 %v1002_v7  ;;  %v1111_v18 = vadd.f32 %v1110_v17, %v867_v11 }
 0x23a   : > { %3061 = vtanh.f32 %v1109_v14  ;;  %v1007_v20 = vpop.f32.mrb[18].mxu0 }
 0x23b   : > { %3063 = vtanh.f32 %v1004_v15  ;;  %v1008_v21 = vadd.f32 %v1007_v20, %v872_v19  ;;  %v1114_v22 = vpop.f32.mrb[18].mxu1  ;;  %v1009_v23 = vpop.f32.mrb[19].mxu0 }
 0x23c   : > { %3065 = vtanh.f32 %v1111_v18  ;;  %v1115_v24 = vadd.f32 %v1114_v22, %v872_v19  ;;  %v1010_v25 = vadd.f32 %v1009_v23, %v872_v19  ;;  %v1116_v26 = vpop.f32.mrb[19].mxu1 }
 0x23d   : > { %3067 = vtanh.f32 %v1008_v21  ;;  %v1117_v27 = vadd.f32 %v1116_v26, %v872_v19 }
 0x23e   : > { %3069 = vtanh.f32 %v1115_v24  ;;  %v1013_v29 = vpop.f32.mrb[20].mxu0 }
 0x23f   : > { %v3052_v30 = vpop.eup %3051  ;;  %3071 = vtanh.f32 %v1010_v25  ;;  %v1014_v31 = vadd.f32 %v1013_v29, %v877_v28  ;;  %v1120_v32 = vpop.f32.mrb[20].mxu1 }
 0x240   : > { %v1015_v33 = vpop.f32.mrb[21].mxu0  ;;  %v3054_v34 = vpop.eup %3053  ;;  %3073 = vtanh.f32 %v1117_v27  ;;  %v1121_v35 = vadd.f32 %v1120_v32, %v877_v28 }
 0x241   : > { %v1016_v36 = vadd.f32 %v1015_v33, %v877_v28  ;;  %v1122_v37 = vpop.f32.mrb[21].mxu1  ;;  %v3056_v38 = vpop.eup %3055  ;;  %3075 = vtanh.f32 %v1014_v31 }
 0x242   : > { %v1123_v39 = vadd.f32 %v1122_v37, %v877_v28  ;;  %v3058_v40 = vpop.eup %3057  ;;  %3077 = vtanh.f32 %v1121_v35  ;;  %v1019_v42 = vpop.f32.mrb[22].mxu0 }
 0x243   : > { %v3060_v43 = vpop.eup %3059  ;;  %3079 = vtanh.f32 %v1016_v36  ;;  %v1020_v44 = vadd.f32 %v1019_v42, %v882_v41  ;;  %v1126_v45 = vpop.f32.mrb[22].mxu1  ;;  %v2536_v42 = vld [vmem:[%s4001_s2 + $0x40] sm:$0xff] }
 0x244   : > { %v1021_v46 = vpop.f32.mrb[23].mxu0  ;;  %v3062_v47 = vpop.eup %3061  ;;  %3081 = vtanh.f32 %v1123_v39  ;;  %v1127_v48 = vadd.f32 %v1126_v45, %v882_v41  ;;  %v2857_v51 = vpack.c.bf16 %v3060_v43, %v3052_v30  ;;  %v2535_v39 = vld [vmem:[%s4001_s2 + $0x38] sm:$0xff]  ;;  %v2537_v43 = vld [vmem:[%s4001_s2 + $0x48] sm:$0xff] }
 0x245   : > { %v1022_v49 = vadd.f32 %v1021_v46, %v882_v41  ;;  %v1128_v50 = vpop.f32.mrb[23].mxu1  ;;  %v3064_v52 = vpop.eup %3063  ;;  %3083 = vtanh.f32 %v1020_v44  ;;  %v2869_v54 = vpack.c.bf16 %v3062_v47, %v3054_v34  ;;  %v2538_v44 = vld [vmem:[%s4001_s2 + $0x50] sm:$0xff]  ;;  %v2539_v45 = vld [vmem:[%s4001_s2 + $0x58] sm:$0xff]  ;;  %v2540_v46 = vld [vmem:[%s4001_s2 + $0x60] sm:$0xff] }
 0x246   : > { %v1129_v53 = vadd.f32 %v1128_v50, %v882_v41  ;;  %v3066_v55 = vpop.eup %3065  ;;  %3085 = vtanh.f32 %v1127_v48  ;;  %v1025_v57 = vpop.f32.mrb[24].mxu0  ;;  %v2855_v58 = vpack.c.bf16 %v3064_v52, %v3056_v38  ;;  %v2541_v47 = vld [vmem:[%s4001_s2 + $0x68] sm:$0x3] }
 0x247   : > { %v3068_v59 = vpop.eup %3067  ;;  %3087 = vtanh.f32 %v1022_v49  ;;  %v1026_v60 = vadd.f32 %v1025_v57, %v887_v56  ;;  %v1132_v61 = vpop.f32.mrb[24].mxu1  ;;  %v2867_v63 = vpack.c.bf16 %v3066_v55, %v3058_v40 }
 0x248   : > { %v1027_v62 = vpop.f32.mrb[25].mxu0  ;;  %v3070_v0 = vpop.eup %3069  ;;  %3089 = vtanh.f32 %v1129_v53  ;;  %v1133_v2 = vadd.f32 %v1132_v61, %v887_v56  ;;  %2856 = vmatprep.subr.bf16.mxu0 %v2855_v58 }
 0x249   : > { %v1028_v3 = vadd.f32 %v1027_v62, %v887_v56  ;;  %v1134_v4 = vpop.f32.mrb[25].mxu1  ;;  %v3072_v5 = vpop.eup %3071  ;;  %3091 = vtanh.f32 %v1026_v60  ;;  %2868 = vmatprep.subr.bf16.mxu1 %v2867_v63  ;;  %2858 = vmatpush1.bf16.msra.mxu0 %v2857_v51 }
 0x24a   : > { %v1135_v6 = vadd.f32 %v1134_v4, %v887_v56  ;;  %v3074_v8 = vpop.eup %3073  ;;  %3093 = vtanh.f32 %v1133_v2  ;;  %2870 = vmatpush1.bf16.msra.mxu1 %v2869_v54  ;;  %v1031_v10 = vpop.f32.mrb[26].mxu0 }
 0x24b   : > { %v3076_v11 = vpop.eup %3075  ;;  %3095 = vtanh.f32 %v1028_v3  ;;  %v1138_v12 = vpop.f32.mrb[26].mxu1  ;;  %v1032_v21 = vadd.f32 %v1031_v10, %v892_v9 }
 0x24c   : > { %v1033_v7 = vpop.f32.mrb[27].mxu0  ;;  %v3078_v1 = vpop.eup %3077  ;;  %3097 = vtanh.f32 %v1135_v6  ;;  %v2861_v15 = vpack.c.bf16 %v3076_v11, %v3068_v59  ;;  %v1139_v24 = vadd.f32 %v1138_v12, %v892_v9 }
 0x24d   : > { %v1034_v13 = vadd.f32 %v1033_v7, %v892_v9  ;;  %v1140_v14 = vpop.f32.mrb[27].mxu1  ;;  %v3080_v17 = vpop.eup %3079  ;;  %v2873_v19 = vpack.c.bf16 %v3078_v1, %v3070_v0 }
 0x24e   : > { %v1141_v18 = vadd.f32 %v1140_v14, %v892_v9  ;;  %v3082_v20 = vpop.eup %3081  ;;  %v2859_v22 = vpack.c.bf16 %v3080_v17, %v3072_v5  ;;  %v1190_v48 = vpop.permute.xlu0 %1189 }
 0x24f   : > { %v3084_v23 = vpop.eup %3083  ;;  %3099 = vtanh.f32 %v1034_v13  ;;  %v2871_v25 = vpack.c.bf16 %v3082_v20, %v3074_v8  ;;  %v1195_v57 = vpop.permute.xlu1 %1194 }
 0x250   : > { %v3086_v26 = vpop.eup %3085  ;;  %3101 = vtanh.f32 %v1141_v18  ;;  %2860 = vmatprep.subr.bf16.mxu0 %v2859_v22 }
 0x251   : > { %v3088_v27 = vpop.eup %3087  ;;  %2872 = vmatprep.subr.bf16.mxu1 %v2871_v25  ;;  %2862 = vmatpush1.bf16.msra.mxu0 %v2861_v15  ;;  %3103 = vtanh.f32 %v1032_v21 }
 0x252   : > { %v3090_v28 = vpop.eup %3089  ;;  %2874 = vmatpush1.bf16.msra.mxu1 %v2873_v19  ;;  %3105 = vtanh.f32 %v1139_v24  ;;  %v1200_v3 = vpop.permute.xlu0 %1199 }
 0x253   : > { %v3092_v29 = vpop.eup %3091  ;;  %v1205_v7 = vpop.permute.xlu1 %1204 }
 0x254   : > { %v3094_v30 = vpop.eup %3093  ;;  %v2865_v31 = vpack.c.bf16 %v3092_v29, %v3084_v23 }
 0x255   : > { %v3096_v32 = vpop.eup %3095  ;;  %v2877_v33 = vpack.c.bf16 %v3094_v30, %v3086_v26 }
 0x256   : > { %v3098_v34 = vpop.eup %3097  ;;  %v2863_v35 = vpack.c.bf16 %v3096_v32, %v3088_v27  ;;  %v1210_v25 = vpop.permute.xlu0 %1209 }
 0x257   : > { %v2875_v36 = vpack.c.bf16 %v3098_v34, %v3090_v28 }
 0x258   : > { %2864 = vmatprep.subr.bf16.mxu0 %v2863_v35 }
 0x259   : > { %v3100_v37 = vpop.eup %3099  ;;  %2876 = vmatprep.subr.bf16.mxu1 %v2875_v36  ;;  %2866 = vmatpush1.bf16.msra.mxu0 %v2865_v31 }
 0x25a   : > { %v3102_v38 = vpop.eup %3101  ;;  %2878 = vmatpush1.bf16.msra.mxu1 %v2877_v33  ;;  %2549 = vmatprep.subr.msk.mxu0 %vm916_vm2, %v3100_v37 }
 0x25b   : > { %2558 = vmatprep.subr.msk.mxu1 %vm916_vm2, %v3102_v38  ;;  %v3104_v40 = vpop.eup %3103 }
 0x25c   : > { %v3106_v41 = vpop.eup %3105 }
 0x25d   : > { %2550 = vmatpush1.msk.msra.mxu0 %vm916_vm2, %v3104_v40  ;;  %v1215_v40 = vpop.permute.xlu1 %1214 }
 0x25e   : > { %2559 = vmatpush1.msk.msra.mxu1 %vm916_vm2, %v3106_v41  ;;  %2551 = vmatmul.mubr.msk.f32.vlgmr.msra.gmra.mrb[28].mxu0 %vm894_vm3, %v2535_v39 }
 0x25f   : > { %2560 = vmatmul.mubr.msk.f32.vlgmr.msra.gmra.mrb[28].mxu1 %vm894_vm3, %v2535_v39  ;;  %1325 = vmatprep.mubr.f32.mxu0 %v3340_v16 }
 0x260   : > { %1432 = vmatprep.mubr.f32.mxu1 %v3340_v16 }
 0x262   : > { %2552 = vmatmul.mubr.msk.f32.gmra.mrb[30].mxu0 %vm894_vm3, %v2536_v42 }
 0x263   : > { %2561 = vmatmul.mubr.msk.f32.gmra.mrb[30].mxu1 %vm894_vm3, %v2536_v42  ;;  %1331 = vmatprep.mubr.f32.mxu0 %v3340_v16 }
 0x264   : > { %1438 = vmatprep.mubr.f32.mxu1 %v3340_v16 }
 0x266   : > { %2553 = vmatmul.mubr.msk.f32.gmra.mrb[32].mxu0 %vm894_vm3, %v2537_v43 }
 0x267   : > { %2562 = vmatmul.mubr.msk.f32.gmra.mrb[32].mxu1 %vm894_vm3, %v2537_v43  ;;  %1337 = vmatprep.mubr.f32.mxu0 %v3340_v16 }
 0x268   : > { %1444 = vmatprep.mubr.f32.mxu1 %v3340_v16 }
 0x26a   : > { %2554 = vmatmul.mubr.msk.f32.gmra.mrb[34].mxu0 %vm894_vm3, %v2538_v44 }
 0x26b   : > { %2563 = vmatmul.mubr.msk.f32.gmra.mrb[34].mxu1 %vm894_vm3, %v2538_v44  ;;  %1343 = vmatprep.mubr.f32.mxu0 %v3340_v16 }
 0x26c   : > { %1450 = vmatprep.mubr.f32.mxu1 %v3340_v16 }
 0x26e   : > { %2555 = vmatmul.mubr.msk.f32.gmra.mrb[36].mxu0 %vm894_vm3, %v2539_v45 }
 0x26f   : > { %2564 = vmatmul.mubr.msk.f32.gmra.mrb[36].mxu1 %vm894_vm3, %v2539_v45  ;;  %1349 = vmatprep.mubr.f32.mxu0 %v3340_v16 }
 0x270   : > { %1456 = vmatprep.mubr.f32.mxu1 %v3340_v16 }
 0x272   : > { %2556 = vmatmul.mubr.msk.f32.gmra.mrb[38].mxu0 %vm894_vm3, %v2540_v46 }
 0x273   : > { %2565 = vmatmul.mubr.msk.f32.gmra.mrb[38].mxu1 %vm894_vm3, %v2540_v46  ;;  %1355 = vmatprep.mubr.f32.mxu0 %v3340_v16 }
 0x274   : > { %1462 = vmatprep.mubr.f32.mxu1 %v3340_v16 }
 0x276   : > { %2557 = vmatmul.mubr.msk.f32.gmra.mrb[40].mxu0 %vm894_vm3, %v2541_v47 }
 0x277   : > { %2566 = vmatmul.mubr.msk.f32.gmra.mrb[40].mxu1 %vm894_vm3, %v2541_v47  ;;  %1645 = vmatprep.mubr.f32.mxu0 %v3340_v16 }
 0x278   : > { %1752 = vmatprep.mubr.f32.mxu1 %v3340_v16 }
 0x331   : > { %v1321_v49 = vpop.f32.mrb[28].mxu0 }
 0x332   : > { %v1322_v50 = vadd.f32 %v1321_v49, %v1190_v48  ;;  %v1428_v51 = vpop.f32.mrb[28].mxu1  ;;  %v1323_v52 = vpop.f32.mrb[29].mxu0 }
 0x333   : > { %v1429_v53 = vadd.f32 %v1428_v51, %v1190_v48  ;;  %v1324_v54 = vadd.f32 %v1323_v52, %v1190_v48  ;;  %v1430_v55 = vpop.f32.mrb[29].mxu1 }
 0x334   : > { %3107 = vtanh.f32 %v1322_v50  ;;  %v1431_v56 = vadd.f32 %v1430_v55, %v1190_v48  ;;  %v1220_v55 = vpop.permute.xlu0 %1219 }
 0x335   : > { %3109 = vtanh.f32 %v1429_v53  ;;  %v1327_v58 = vpop.f32.mrb[30].mxu0 }
 0x336   : > { %3111 = vtanh.f32 %v1324_v54  ;;  %v1328_v59 = vadd.f32 %v1327_v58, %v1195_v57  ;;  %v1434_v60 = vpop.f32.mrb[30].mxu1  ;;  %v1329_v61 = vpop.f32.mrb[31].mxu0 }
 0x337   : > { %3113 = vtanh.f32 %v1431_v56  ;;  %v1435_v62 = vadd.f32 %v1434_v60, %v1195_v57  ;;  %v1330_v63 = vadd.f32 %v1329_v61, %v1195_v57  ;;  %v1436_v0 = vpop.f32.mrb[31].mxu1 }
 0x338   : > { %3115 = vtanh.f32 %v1328_v59  ;;  %v1437_v2 = vadd.f32 %v1436_v0, %v1195_v57 }
 0x339   : > { %3117 = vtanh.f32 %v1435_v62  ;;  %v1333_v4 = vpop.f32.mrb[32].mxu0 }
 0x33a   : > { %3119 = vtanh.f32 %v1330_v63  ;;  %v1334_v5 = vadd.f32 %v1333_v4, %v1200_v3  ;;  %v1440_v6 = vpop.f32.mrb[32].mxu1  ;;  %v1335_v8 = vpop.f32.mrb[33].mxu0 }
 0x33b   : > { %3121 = vtanh.f32 %v1437_v2  ;;  %v1441_v9 = vadd.f32 %v1440_v6, %v1200_v3  ;;  %v1336_v10 = vadd.f32 %v1335_v8, %v1200_v3  ;;  %v1442_v11 = vpop.f32.mrb[33].mxu1 }
 0x33c   : > { %3123 = vtanh.f32 %v1334_v5  ;;  %v1443_v12 = vadd.f32 %v1442_v11, %v1200_v3 }
 0x33d   : > { %3125 = vtanh.f32 %v1441_v9  ;;  %v1339_v1 = vpop.f32.mrb[34].mxu0 }
 0x33e   : > { %v3108_v13 = vpop.eup %3107  ;;  %3127 = vtanh.f32 %v1336_v10  ;;  %v1340_v14 = vadd.f32 %v1339_v1, %v1205_v7  ;;  %v1446_v15 = vpop.f32.mrb[34].mxu1 }
 0x33f   : > { %v1341_v17 = vpop.f32.mrb[35].mxu0  ;;  %v3110_v18 = vpop.eup %3109  ;;  %3129 = vtanh.f32 %v1443_v12  ;;  %v1447_v19 = vadd.f32 %v1446_v15, %v1205_v7 }
 0x340   : > { %v1342_v20 = vadd.f32 %v1341_v17, %v1205_v7  ;;  %v1448_v21 = vpop.f32.mrb[35].mxu1  ;;  %v3112_v22 = vpop.eup %3111  ;;  %3131 = vtanh.f32 %v1340_v14 }
 0x341   : > { %v1449_v23 = vadd.f32 %v1448_v21, %v1205_v7  ;;  %v3114_v24 = vpop.eup %3113  ;;  %3133 = vtanh.f32 %v1447_v19  ;;  %v1345_v26 = vpop.f32.mrb[36].mxu0 }
 0x342   : > { %v3116_v27 = vpop.eup %3115  ;;  %3135 = vtanh.f32 %v1342_v20  ;;  %v1346_v28 = vadd.f32 %v1345_v26, %v1210_v25  ;;  %v1452_v29 = vpop.f32.mrb[36].mxu1  ;;  %v2568_v26 = vld [vmem:[%s4001_s2 + $0x78] sm:$0xff] }
 0x343   : > { %v1347_v30 = vpop.f32.mrb[37].mxu0  ;;  %v3118_v31 = vpop.eup %3117  ;;  %3137 = vtanh.f32 %v1449_v23  ;;  %v1453_v32 = vadd.f32 %v1452_v29, %v1210_v25  ;;  %v2881_v35 = vpack.c.bf16 %v3116_v27, %v3108_v13  ;;  %v2567_v23 = vld [vmem:[%s4001_s2 + $0x70] sm:$0xff]  ;;  %v2569_v27 = vld [vmem:[%s4001_s2 + $0x80] sm:$0xff] }
 0x344   : > { %v1348_v33 = vadd.f32 %v1347_v30, %v1210_v25  ;;  %v1454_v34 = vpop.f32.mrb[37].mxu1  ;;  %v3120_v36 = vpop.eup %3119  ;;  %3139 = vtanh.f32 %v1346_v28  ;;  %v2893_v38 = vpack.c.bf16 %v3118_v31, %v3110_v18  ;;  %v2570_v28 = vld [vmem:[%s4001_s2 + $0x88] sm:$0xff]  ;;  %v2571_v29 = vld [vmem:[%s4001_s2 + $0x90] sm:$0xff]  ;;  %v2572_v30 = vld [vmem:[%s4001_s2 + $0x98] sm:$0xff] }
 0x345   : > { %v1455_v37 = vadd.f32 %v1454_v34, %v1210_v25  ;;  %v3122_v39 = vpop.eup %3121  ;;  %3141 = vtanh.f32 %v1453_v32  ;;  %v1351_v41 = vpop.f32.mrb[38].mxu0  ;;  %v2879_v42 = vpack.c.bf16 %v3120_v36, %v3112_v22  ;;  %v2573_v31 = vld [vmem:[%s4001_s2 + $0xa0] sm:$0x3] }
 0x346   : > { %v3124_v43 = vpop.eup %3123  ;;  %3143 = vtanh.f32 %v1348_v33  ;;  %v1352_v44 = vadd.f32 %v1351_v41, %v1215_v40  ;;  %v1458_v45 = vpop.f32.mrb[38].mxu1  ;;  %v2891_v47 = vpack.c.bf16 %v3122_v39, %v3114_v24 }
 0x347   : > { %v1353_v46 = vpop.f32.mrb[39].mxu0  ;;  %v3126_v48 = vpop.eup %3125  ;;  %3145 = vtanh.f32 %v1455_v37  ;;  %v1459_v49 = vadd.f32 %v1458_v45, %v1215_v40  ;;  %2880 = vmatprep.subr.bf16.mxu0 %v2879_v42 }
 0x348   : > { %v1354_v50 = vadd.f32 %v1353_v46, %v1215_v40  ;;  %v1460_v51 = vpop.f32.mrb[39].mxu1  ;;  %v3128_v52 = vpop.eup %3127  ;;  %3147 = vtanh.f32 %v1352_v44  ;;  %2892 = vmatprep.subr.bf16.mxu1 %v2891_v47  ;;  %2882 = vmatpush1.bf16.msra.mxu0 %v2881_v35 }
 0x349   : > { %v1461_v53 = vadd.f32 %v1460_v51, %v1215_v40  ;;  %v3130_v54 = vpop.eup %3129  ;;  %3149 = vtanh.f32 %v1459_v49  ;;  %2894 = vmatpush1.bf16.msra.mxu1 %v2893_v38  ;;  %v1357_v56 = vpop.f32.mrb[40].mxu0 }
 0x34a   : > { %v3132_v57 = vpop.eup %3131  ;;  %3151 = vtanh.f32 %v1354_v50  ;;  %v1464_v58 = vpop.f32.mrb[40].mxu1  ;;  %v1358_v5 = vadd.f32 %v1357_v56, %v1220_v55 }
 0x34b   : > { %v1359_v59 = vpop.f32.mrb[41].mxu0  ;;  %v3134_v60 = vpop.eup %3133  ;;  %3153 = vtanh.f32 %v1461_v53  ;;  %v2885_v63 = vpack.c.bf16 %v3132_v57, %v3124_v43  ;;  %v1465_v9 = vadd.f32 %v1464_v58, %v1220_v55 }
 0x34c   : > { %v1360_v61 = vadd.f32 %v1359_v59, %v1220_v55  ;;  %v1466_v62 = vpop.f32.mrb[41].mxu1  ;;  %v3136_v0 = vpop.eup %3135  ;;  %v2897_v3 = vpack.c.bf16 %v3134_v60, %v3126_v48 }
 0x34d   : > { %v1467_v2 = vadd.f32 %v1466_v62, %v1220_v55  ;;  %v3138_v4 = vpop.eup %3137  ;;  %v2883_v6 = vpack.c.bf16 %v3136_v0, %v3128_v52  ;;  %v1516_v32 = vpop.permute.xlu1 %1515 }
 0x34e   : > { %v3140_v8 = vpop.eup %3139  ;;  %3155 = vtanh.f32 %v1360_v61  ;;  %v2895_v10 = vpack.c.bf16 %v3138_v4, %v3130_v54  ;;  %v1521_v41 = vpop.permute.xlu0 %1520 }
 0x34f   : > { %v3142_v11 = vpop.eup %3141  ;;  %3157 = vtanh.f32 %v1467_v2  ;;  %2884 = vmatprep.subr.bf16.mxu0 %v2883_v6 }
 0x350   : > { %v3144_v12 = vpop.eup %3143  ;;  %2896 = vmatprep.subr.bf16.mxu1 %v2895_v10  ;;  %2886 = vmatpush1.bf16.msra.mxu0 %v2885_v63  ;;  %3159 = vtanh.f32 %v1358_v5 }
 0x351   : > { %v3146_v7 = vpop.eup %3145  ;;  %2898 = vmatpush1.bf16.msra.mxu1 %v2897_v3  ;;  %3161 = vtanh.f32 %v1465_v9  ;;  %v1526_v50 = vpop.permute.xlu1 %1525 }
 0x352   : > { %v3148_v1 = vpop.eup %3147  ;;  %v1531_v59 = vpop.permute.xlu0 %1530 }
 0x353   : > { %v3150_v13 = vpop.eup %3149  ;;  %v2889_v14 = vpack.c.bf16 %v3148_v1, %v3140_v8 }
 0x354   : > { %v3152_v15 = vpop.eup %3151  ;;  %v2901_v17 = vpack.c.bf16 %v3150_v13, %v3142_v11 }
 0x355   : > { %v3154_v18 = vpop.eup %3153  ;;  %v2887_v19 = vpack.c.bf16 %v3152_v15, %v3144_v12  ;;  %v1536_v10 = vpop.permute.xlu1 %1535 }
 0x356   : > { %v2899_v20 = vpack.c.bf16 %v3154_v18, %v3146_v7 }
 0x357   : > { %2888 = vmatprep.subr.bf16.mxu0 %v2887_v19 }
 0x358   : > { %v3156_v21 = vpop.eup %3155  ;;  %2900 = vmatprep.subr.bf16.mxu1 %v2899_v20  ;;  %2890 = vmatpush1.bf16.msra.mxu0 %v2889_v14 }
 0x359   : > { %v3158_v22 = vpop.eup %3157  ;;  %2902 = vmatpush1.bf16.msra.mxu1 %v2901_v17  ;;  %2581 = vmatprep.subr.msk.mxu0 %vm916_vm2, %v3156_v21 }
 0x35a   : > { %2590 = vmatprep.subr.msk.mxu1 %vm916_vm2, %v3158_v22  ;;  %v3160_v24 = vpop.eup %3159 }
 0x35b   : > { %v3162_v25 = vpop.eup %3161 }
 0x35c   : > { %2582 = vmatpush1.msk.msra.mxu0 %vm916_vm2, %v3160_v24  ;;  %v1541_v24 = vpop.permute.xlu0 %1540 }
 0x35d   : > { %2591 = vmatpush1.msk.msra.mxu1 %vm916_vm2, %v3162_v25  ;;  %2583 = vmatmul.mubr.msk.f32.vlgmr.msra.gmra.mrb[42].mxu0 %vm894_vm3, %v2567_v23 }
 0x35e   : > { %2592 = vmatmul.mubr.msk.f32.vlgmr.msra.gmra.mrb[42].mxu1 %vm894_vm3, %v2567_v23  ;;  %1651 = vmatprep.mubr.f32.mxu0 %v3340_v16 }
 0x35f   : > { %1758 = vmatprep.mubr.f32.mxu1 %v3340_v16 }
 0x361   : > { %2584 = vmatmul.mubr.msk.f32.gmra.mrb[44].mxu0 %vm894_vm3, %v2568_v26 }
 0x362   : > { %2593 = vmatmul.mubr.msk.f32.gmra.mrb[44].mxu1 %vm894_vm3, %v2568_v26  ;;  %1657 = vmatprep.mubr.f32.mxu0 %v3340_v16 }
 0x363   : > { %1764 = vmatprep.mubr.f32.mxu1 %v3340_v16 }
 0x365   : > { %2585 = vmatmul.mubr.msk.f32.gmra.mrb[46].mxu0 %vm894_vm3, %v2569_v27 }
 0x366   : > { %2594 = vmatmul.mubr.msk.f32.gmra.mrb[46].mxu1 %vm894_vm3, %v2569_v27  ;;  %1663 = vmatprep.mubr.f32.mxu0 %v3340_v16 }
 0x367   : > { %1770 = vmatprep.mubr.f32.mxu1 %v3340_v16 }
 0x369   : > { %2586 = vmatmul.mubr.msk.f32.gmra.mrb[48].mxu0 %vm894_vm3, %v2570_v28 }
 0x36a   : > { %2595 = vmatmul.mubr.msk.f32.gmra.mrb[48].mxu1 %vm894_vm3, %v2570_v28  ;;  %1669 = vmatprep.mubr.f32.mxu0 %v3340_v16 }
 0x36b   : > { %1776 = vmatprep.mubr.f32.mxu1 %v3340_v16 }
 0x36d   : > { %2587 = vmatmul.mubr.msk.f32.gmra.mrb[50].mxu0 %vm894_vm3, %v2571_v29 }
 0x36e   : > { %2596 = vmatmul.mubr.msk.f32.gmra.mrb[50].mxu1 %vm894_vm3, %v2571_v29  ;;  %1675 = vmatprep.mubr.f32.mxu0 %v3340_v16 }
 0x36f   : > { %1782 = vmatprep.mubr.f32.mxu1 %v3340_v16 }
 0x371   : > { %2588 = vmatmul.mubr.msk.f32.gmra.mrb[52].mxu0 %vm894_vm3, %v2572_v30 }
 0x372   : > { %2597 = vmatmul.mubr.msk.f32.gmra.mrb[52].mxu1 %vm894_vm3, %v2572_v30  ;;  %1681 = vmatprep.mubr.f32.mxu0 %v3340_v16 }
 0x373   : > { %1788 = vmatprep.mubr.f32.mxu1 %v3340_v16 }
 0x375   : > { %2589 = vmatmul.mubr.msk.f32.gmra.mrb[54].mxu0 %vm894_vm3, %v2573_v31 }
 0x376   : > { %2598 = vmatmul.mubr.msk.f32.gmra.mrb[54].mxu1 %vm894_vm3, %v2573_v31  ;;  %1971 = vmatprep.mubr.f32.mxu0 %v3340_v16 }
 0x377   : > { %2078 = vmatprep.mubr.f32.mxu1 %v3340_v16 }
 0x430   : > { %v1647_v33 = vpop.f32.mrb[42].mxu0 }
 0x431   : > { %v1648_v34 = vadd.f32 %v1647_v33, %v1516_v32  ;;  %v1754_v35 = vpop.f32.mrb[42].mxu1  ;;  %v1649_v36 = vpop.f32.mrb[43].mxu0 }
 0x432   : > { %v1755_v37 = vadd.f32 %v1754_v35, %v1516_v32  ;;  %v1650_v38 = vadd.f32 %v1649_v36, %v1516_v32  ;;  %v1756_v39 = vpop.f32.mrb[43].mxu1 }
 0x433   : > { %3163 = vtanh.f32 %v1648_v34  ;;  %v1757_v40 = vadd.f32 %v1756_v39, %v1516_v32  ;;  %v1546_v39 = vpop.permute.xlu1 %1545 }
 0x434   : > { %3165 = vtanh.f32 %v1755_v37  ;;  %v1653_v42 = vpop.f32.mrb[44].mxu0 }
 0x435   : > { %3167 = vtanh.f32 %v1650_v38  ;;  %v1654_v43 = vadd.f32 %v1653_v42, %v1521_v41  ;;  %v1760_v44 = vpop.f32.mrb[44].mxu1  ;;  %v1655_v45 = vpop.f32.mrb[45].mxu0 }
 0x436   : > { %3169 = vtanh.f32 %v1757_v40  ;;  %v1761_v46 = vadd.f32 %v1760_v44, %v1521_v41  ;;  %v1656_v47 = vadd.f32 %v1655_v45, %v1521_v41  ;;  %v1762_v48 = vpop.f32.mrb[45].mxu1 }
 0x437   : > { %3171 = vtanh.f32 %v1654_v43  ;;  %v1763_v49 = vadd.f32 %v1762_v48, %v1521_v41 }
 0x438   : > { %3173 = vtanh.f32 %v1761_v46  ;;  %v1659_v51 = vpop.f32.mrb[46].mxu0 }
 0x439   : > { %3175 = vtanh.f32 %v1656_v47  ;;  %v1660_v52 = vadd.f32 %v1659_v51, %v1526_v50  ;;  %v1766_v53 = vpop.f32.mrb[46].mxu1  ;;  %v1661_v54 = vpop.f32.mrb[47].mxu0 }
 0x43a   : > { %3177 = vtanh.f32 %v1763_v49  ;;  %v1767_v55 = vadd.f32 %v1766_v53, %v1526_v50  ;;  %v1662_v56 = vadd.f32 %v1661_v54, %v1526_v50  ;;  %v1768_v57 = vpop.f32.mrb[47].mxu1 }
 0x43b   : > { %3179 = vtanh.f32 %v1660_v52  ;;  %v1769_v58 = vadd.f32 %v1768_v57, %v1526_v50 }
 0x43c   : > { %3181 = vtanh.f32 %v1767_v55  ;;  %v1665_v60 = vpop.f32.mrb[48].mxu0 }
 0x43d   : > { %v3164_v61 = vpop.eup %3163  ;;  %3183 = vtanh.f32 %v1662_v56  ;;  %v1666_v62 = vadd.f32 %v1665_v60, %v1531_v59  ;;  %v1772_v63 = vpop.f32.mrb[48].mxu1 }
 0x43e   : > { %v1667_v0 = vpop.f32.mrb[49].mxu0  ;;  %v3166_v2 = vpop.eup %3165  ;;  %3185 = vtanh.f32 %v1769_v58  ;;  %v1773_v3 = vadd.f32 %v1772_v63, %v1531_v59 }
 0x43f   : > { %v1668_v4 = vadd.f32 %v1667_v0, %v1531_v59  ;;  %v1774_v5 = vpop.f32.mrb[49].mxu1  ;;  %v3168_v6 = vpop.eup %3167  ;;  %3187 = vtanh.f32 %v1666_v62 }
 0x440   : > { %v1775_v8 = vadd.f32 %v1774_v5, %v1531_v59  ;;  %v3170_v9 = vpop.eup %3169  ;;  %3189 = vtanh.f32 %v1773_v3  ;;  %v1671_v11 = vpop.f32.mrb[50].mxu0 }
 0x441   : > { %v3172_v12 = vpop.eup %3171  ;;  %3191 = vtanh.f32 %v1668_v4  ;;  %v1672_v7 = vadd.f32 %v1671_v11, %v1536_v10  ;;  %v1778_v1 = vpop.f32.mrb[50].mxu1  ;;  %v2600_v11 = vld [vmem:[%s4001_s2 + $0xb0] sm:$0xff] }
 0x442   : > { %v1673_v13 = vpop.f32.mrb[51].mxu0  ;;  %v3174_v14 = vpop.eup %3173  ;;  %3193 = vtanh.f32 %v1775_v8  ;;  %v1779_v15 = vadd.f32 %v1778_v1, %v1536_v10  ;;  %v2905_v19 = vpack.c.bf16 %v3172_v12, %v3164_v61  ;;  %v2599_v8 = vld [vmem:[%s4001_s2 + $0xa8] sm:$0xff]  ;;  %v2601_v12 = vld [vmem:[%s4001_s2 + $0xb8] sm:$0xff] }
 0x443   : > { %v1674_v17 = vadd.f32 %v1673_v13, %v1536_v10  ;;  %v1780_v18 = vpop.f32.mrb[51].mxu1  ;;  %v3176_v20 = vpop.eup %3175  ;;  %3195 = vtanh.f32 %v1672_v7  ;;  %v2917_v22 = vpack.c.bf16 %v3174_v14, %v3166_v2  ;;  %v2602_v7 = vld [vmem:[%s4001_s2 + $0xc0] sm:$0xff]  ;;  %v2603_v1 = vld [vmem:[%s4001_s2 + $0xc8] sm:$0xff]  ;;  %v2604_v13 = vld [vmem:[%s4001_s2 + $0xd0] sm:$0xff] }
 0x444   : > { %v1781_v21 = vadd.f32 %v1780_v18, %v1536_v10  ;;  %v3178_v23 = vpop.eup %3177  ;;  %3197 = vtanh.f32 %v1779_v15  ;;  %v1677_v25 = vpop.f32.mrb[52].mxu0  ;;  %v2903_v26 = vpack.c.bf16 %v3176_v20, %v3168_v6  ;;  %v2605_v14 = vld [vmem:[%s4001_s2 + $0xd8] sm:$0x3] }
 0x445   : > { %v3180_v27 = vpop.eup %3179  ;;  %3199 = vtanh.f32 %v1674_v17  ;;  %v1678_v28 = vadd.f32 %v1677_v25, %v1541_v24  ;;  %v1784_v29 = vpop.f32.mrb[52].mxu1  ;;  %v2915_v31 = vpack.c.bf16 %v3178_v23, %v3170_v9 }
 0x446   : > { %v1679_v30 = vpop.f32.mrb[53].mxu0  ;;  %v3182_v32 = vpop.eup %3181  ;;  %3201 = vtanh.f32 %v1781_v21  ;;  %v1785_v33 = vadd.f32 %v1784_v29, %v1541_v24  ;;  %2904 = vmatprep.subr.bf16.mxu0 %v2903_v26 }
 0x447   : > { %v1680_v34 = vadd.f32 %v1679_v30, %v1541_v24  ;;  %v1786_v35 = vpop.f32.mrb[53].mxu1  ;;  %v3184_v36 = vpop.eup %3183  ;;  %3203 = vtanh.f32 %v1678_v28  ;;  %2916 = vmatprep.subr.bf16.mxu1 %v2915_v31  ;;  %2906 = vmatpush1.bf16.msra.mxu0 %v2905_v19 }
 0x448   : > { %v1787_v37 = vadd.f32 %v1786_v35, %v1541_v24  ;;  %v3186_v38 = vpop.eup %3185  ;;  %3205 = vtanh.f32 %v1785_v33  ;;  %2918 = vmatpush1.bf16.msra.mxu1 %v2917_v22  ;;  %v1683_v40 = vpop.f32.mrb[54].mxu0 }
 0x449   : > { %v3188_v41 = vpop.eup %3187  ;;  %3207 = vtanh.f32 %v1680_v34  ;;  %v1790_v42 = vpop.f32.mrb[54].mxu1  ;;  %v1684_v52 = vadd.f32 %v1683_v40, %v1546_v39 }
 0x44a   : > { %v1685_v43 = vpop.f32.mrb[55].mxu0  ;;  %v3190_v44 = vpop.eup %3189  ;;  %3209 = vtanh.f32 %v1787_v37  ;;  %v2909_v47 = vpack.c.bf16 %v3188_v41, %v3180_v27  ;;  %v1791_v55 = vadd.f32 %v1790_v42, %v1546_v39 }
 0x44b   : > { %v1686_v45 = vadd.f32 %v1685_v43, %v1546_v39  ;;  %v1792_v46 = vpop.f32.mrb[55].mxu1  ;;  %v3192_v48 = vpop.eup %3191  ;;  %v2921_v50 = vpack.c.bf16 %v3190_v44, %v3182_v32 }
 0x44c   : > { %v1793_v49 = vadd.f32 %v1792_v46, %v1546_v39  ;;  %v3194_v51 = vpop.eup %3193  ;;  %v2907_v53 = vpack.c.bf16 %v3192_v48, %v3184_v36  ;;  %v1842_v15 = vpop.permute.xlu0 %1841 }
 0x44d   : > { %v3196_v54 = vpop.eup %3195  ;;  %3211 = vtanh.f32 %v1686_v45  ;;  %v2919_v56 = vpack.c.bf16 %v3194_v51, %v3186_v38  ;;  %v1847_v25 = vpop.permute.xlu1 %1846 }
 0x44e   : > { %v3198_v57 = vpop.eup %3197  ;;  %3213 = vtanh.f32 %v1793_v49  ;;  %2908 = vmatprep.subr.bf16.mxu0 %v2907_v53 }
 0x44f   : > { %v3200_v58 = vpop.eup %3199  ;;  %2920 = vmatprep.subr.bf16.mxu1 %v2919_v56  ;;  %2910 = vmatpush1.bf16.msra.mxu0 %v2909_v47  ;;  %3215 = vtanh.f32 %v1684_v52 }
 0x450   : > { %v3202_v59 = vpop.eup %3201  ;;  %2922 = vmatpush1.bf16.msra.mxu1 %v2921_v50  ;;  %3217 = vtanh.f32 %v1791_v55  ;;  %v1852_v33 = vpop.permute.xlu0 %1851 }
 0x451   : > { %v3204_v60 = vpop.eup %3203  ;;  %v1857_v42 = vpop.permute.xlu1 %1856 }
 0x452   : > { %v3206_v61 = vpop.eup %3205  ;;  %v2913_v62 = vpack.c.bf16 %v3204_v60, %v3196_v54 }
 0x453   : > { %v3208_v63 = vpop.eup %3207  ;;  %v2925_v0 = vpack.c.bf16 %v3206_v61, %v3198_v57 }
 0x454   : > { %v3210_v2 = vpop.eup %3209  ;;  %v2911_v3 = vpack.c.bf16 %v3208_v63, %v3200_v58  ;;  %v1862_v55 = vpop.permute.xlu0 %1861 }
 0x455   : > { %v2923_v4 = vpack.c.bf16 %v3210_v2, %v3202_v59 }
 0x456   : > { %2912 = vmatprep.subr.bf16.mxu0 %v2911_v3 }
 0x457   : > { %v3212_v5 = vpop.eup %3211  ;;  %2924 = vmatprep.subr.bf16.mxu1 %v2923_v4  ;;  %2914 = vmatpush1.bf16.msra.mxu0 %v2913_v62 }
 0x458   : > { %v3214_v6 = vpop.eup %3213  ;;  %2926 = vmatpush1.bf16.msra.mxu1 %v2925_v0  ;;  %2613 = vmatprep.subr.msk.mxu0 %vm916_vm2, %v3212_v5 }
 0x459   : > { %2622 = vmatprep.subr.msk.mxu1 %vm916_vm2, %v3214_v6  ;;  %v3216_v9 = vpop.eup %3215 }
 0x45a   : > { %v3218_v10 = vpop.eup %3217 }
 0x45b   : > { %2614 = vmatpush1.msk.msra.mxu0 %vm916_vm2, %v3216_v9 }
 0x45c   : > { %2623 = vmatpush1.msk.msra.mxu1 %vm916_vm2, %v3218_v10  ;;  %2615 = vmatmul.mubr.msk.f32.vlgmr.msra.gmra.mrb[56].mxu0 %vm894_vm3, %v2599_v8 }
 0x45d   : > { %2624 = vmatmul.mubr.msk.f32.vlgmr.msra.gmra.mrb[56].mxu1 %vm894_vm3, %v2599_v8  ;;  %1977 = vmatprep.mubr.f32.mxu0 %v3340_v16  ;;  %v1867_v8 = vpop.permute.xlu1 %1866 }
 0x45e   : > { %2084 = vmatprep.mubr.f32.mxu1 %v3340_v16 }
 0x460   : > { %2616 = vmatmul.mubr.msk.f32.gmra.mrb[58].mxu0 %vm894_vm3, %v2600_v11 }
 0x461   : > { %2625 = vmatmul.mubr.msk.f32.gmra.mrb[58].mxu1 %vm894_vm3, %v2600_v11  ;;  %1983 = vmatprep.mubr.f32.mxu0 %v3340_v16 }
 0x462   : > { %2090 = vmatprep.mubr.f32.mxu1 %v3340_v16 }
 0x464   : > { %2617 = vmatmul.mubr.msk.f32.gmra.mrb[60].mxu0 %vm894_vm3, %v2601_v12 }
 0x465   : > { %2626 = vmatmul.mubr.msk.f32.gmra.mrb[60].mxu1 %vm894_vm3, %v2601_v12  ;;  %1989 = vmatprep.mubr.f32.mxu0 %v3340_v16 }
 0x466   : > { %2096 = vmatprep.mubr.f32.mxu1 %v3340_v16 }
 0x468   : > { %2618 = vmatmul.mubr.msk.f32.gmra.mrb[62].mxu0 %vm894_vm3, %v2602_v7 }
 0x469   : > { %2627 = vmatmul.mubr.msk.f32.gmra.mrb[62].mxu1 %vm894_vm3, %v2602_v7  ;;  %1995 = vmatprep.mubr.f32.mxu0 %v3340_v16 }
 0x46a   : > { %2102 = vmatprep.mubr.f32.mxu1 %v3340_v16 }
 0x46c   : > { %2619 = vmatmul.mubr.msk.f32.gmra.mrb[64].mxu0 %vm894_vm3, %v2603_v1 }
 0x46d   : > { %2628 = vmatmul.mubr.msk.f32.gmra.mrb[64].mxu1 %vm894_vm3, %v2603_v1  ;;  %2001 = vmatprep.mubr.f32.mxu0 %v3340_v16 }
 0x46e   : > { %2108 = vmatprep.mubr.f32.mxu1 %v3340_v16 }
 0x470   : > { %2620 = vmatmul.mubr.msk.f32.gmra.mrb[66].mxu0 %vm894_vm3, %v2604_v13 }
 0x471   : > { %2629 = vmatmul.mubr.msk.f32.gmra.mrb[66].mxu1 %vm894_vm3, %v2604_v13  ;;  %2007 = vmatprep.mubr.f32.mxu0 %v3340_v16 }
 0x472   : > { %2114 = vmatprep.mubr.f32.mxu1 %v3340_v16 }
 0x474   : > { %2621 = vmatmul.mubr.msk.f32.gmra.mrb[68].mxu0 %vm894_vm3, %v2605_v14 }
 0x475   : > { %2630 = vmatmul.mubr.msk.f32.gmra.mrb[68].mxu1 %vm894_vm3, %v2605_v14  ;;  %2239 = vmatprep.mubr.f32.mxu0 %v3340_v16 }
 0x476   : > { %2310 = vmatprep.mubr.f32.mxu1 %v3340_v16 }
 0x52f   : > { %v1973_v17 = vpop.f32.mrb[56].mxu0 }
 0x530   : > { %v1974_v18 = vadd.f32 %v1973_v17, %v1842_v15  ;;  %v2080_v19 = vpop.f32.mrb[56].mxu1  ;;  %v1975_v20 = vpop.f32.mrb[57].mxu0 }
 0x531   : > { %v2081_v21 = vadd.f32 %v2080_v19, %v1842_v15  ;;  %v1976_v22 = vadd.f32 %v1975_v20, %v1842_v15  ;;  %v2082_v23 = vpop.f32.mrb[57].mxu1 }
 0x532   : > { %3219 = vtanh.f32 %v1974_v18  ;;  %v2083_v24 = vadd.f32 %v2082_v23, %v1842_v15 }
 0x533   : > { %3221 = vtanh.f32 %v2081_v21  ;;  %v1979_v26 = vpop.f32.mrb[58].mxu0 }
 0x534   : > { %3223 = vtanh.f32 %v1976_v22  ;;  %v1980_v27 = vadd.f32 %v1979_v26, %v1847_v25  ;;  %v2086_v28 = vpop.f32.mrb[58].mxu1  ;;  %v1981_v29 = vpop.f32.mrb[59].mxu0 }
 0x535   : > { %3225 = vtanh.f32 %v2083_v24  ;;  %v2087_v30 = vadd.f32 %v2086_v28, %v1847_v25  ;;  %v1982_v16 = vadd.f32 %v1981_v29, %v1847_v25  ;;  %v2088_v31 = vpop.f32.mrb[59].mxu1  ;;  %v1872_v22 = vpop.permute.xlu0 %1871 }
 0x536   : > { %3227 = vtanh.f32 %v1980_v27  ;;  %v2089_v32 = vadd.f32 %v2088_v31, %v1847_v25 }
 0x537   : > { %3229 = vtanh.f32 %v2087_v30  ;;  %v1985_v34 = vpop.f32.mrb[60].mxu0 }
 0x538   : > { %3231 = vtanh.f32 %v1982_v16  ;;  %v1986_v35 = vadd.f32 %v1985_v34, %v1852_v33  ;;  %v2092_v36 = vpop.f32.mrb[60].mxu1  ;;  %v1987_v37 = vpop.f32.mrb[61].mxu0 }
 0x539   : > { %3233 = vtanh.f32 %v2089_v32  ;;  %v2093_v38 = vadd.f32 %v2092_v36, %v1852_v33  ;;  %v1988_v39 = vadd.f32 %v1987_v37, %v1852_v33  ;;  %v2094_v40 = vpop.f32.mrb[61].mxu1 }
 0x53a   : > { %3235 = vtanh.f32 %v1986_v35  ;;  %v2095_v41 = vadd.f32 %v2094_v40, %v1852_v33 }
 0x53b   : > { %3237 = vtanh.f32 %v2093_v38  ;;  %v1991_v43 = vpop.f32.mrb[62].mxu0 }
 0x53c   : > { %v3220_v44 = vpop.eup %3219  ;;  %3239 = vtanh.f32 %v1988_v39  ;;  %v1992_v45 = vadd.f32 %v1991_v43, %v1857_v42  ;;  %v2098_v46 = vpop.f32.mrb[62].mxu1 }
 0x53d   : > { %v1993_v47 = vpop.f32.mrb[63].mxu0  ;;  %v3222_v48 = vpop.eup %3221  ;;  %3241 = vtanh.f32 %v2095_v41  ;;  %v2099_v49 = vadd.f32 %v2098_v46, %v1857_v42 }
 0x53e   : > { %v1994_v50 = vadd.f32 %v1993_v47, %v1857_v42  ;;  %v2100_v51 = vpop.f32.mrb[63].mxu1  ;;  %v3224_v52 = vpop.eup %3223  ;;  %3243 = vtanh.f32 %v1992_v45 }
 0x53f   : > { %v2101_v53 = vadd.f32 %v2100_v51, %v1857_v42  ;;  %v3226_v54 = vpop.eup %3225  ;;  %3245 = vtanh.f32 %v2099_v49  ;;  %v1997_v56 = vpop.f32.mrb[64].mxu0 }
 0x540   : > { %v3228_v57 = vpop.eup %3227  ;;  %3247 = vtanh.f32 %v1994_v50  ;;  %v1998_v58 = vadd.f32 %v1997_v56, %v1862_v55  ;;  %v2104_v59 = vpop.f32.mrb[64].mxu1 }
 0x541   : > { %v1999_v60 = vpop.f32.mrb[65].mxu0  ;;  %v3230_v61 = vpop.eup %3229  ;;  %3249 = vtanh.f32 %v2101_v53  ;;  %v2105_v62 = vadd.f32 %v2104_v59, %v1862_v55  ;;  %v2929_v2 = vpack.c.bf16 %v3228_v57, %v3220_v44  ;;  %v3341_v57 = vmov 1966171168  }
 0x542   : > { %v2000_v63 = vadd.f32 %v1999_v60, %v1862_v55  ;;  %v2106_v0 = vpop.f32.mrb[65].mxu1  ;;  %v3232_v3 = vpop.eup %3231  ;;  %3251 = vtanh.f32 %v1998_v58  ;;  %v2941_v5 = vpack.c.bf16 %v3230_v61, %v3222_v48  ;;  %v2324_v58 = vunpack.c.l.s4 %v3341_v57 }
 0x543   : > { %v2107_v4 = vadd.f32 %v2106_v0, %v1862_v55  ;;  %v3234_v6 = vpop.eup %3233  ;;  %3253 = vtanh.f32 %v2105_v62  ;;  %v2003_v9 = vpop.f32.mrb[66].mxu0  ;;  %v2927_v10 = vpack.c.bf16 %v3232_v3, %v3224_v52  ;;  %v2149_v52 = vld [vmem:[%s4002_s3] sm:$0x1]  ;;  %v2156_v55 = vlaneseq }
 0x544   : > { %v3236_v11 = vpop.eup %3235  ;;  %3255 = vtanh.f32 %v2000_v63  ;;  %v2004_v12 = vadd.f32 %v2003_v9, %v1867_v8  ;;  %v2110_v7 = vpop.f32.mrb[66].mxu1  ;;  %v2939_v13 = vpack.c.bf16 %v3234_v6, %v3226_v54  ;;  %v2325_v61 = vunpack.c.0.s8 %v2324_v58 }
 0x545   : > { %v2005_v1 = vpop.f32.mrb[67].mxu0  ;;  %v3238_v14 = vpop.eup %3237  ;;  %3257 = vtanh.f32 %v2107_v4  ;;  %v2111_v15 = vadd.f32 %v2110_v7, %v1867_v8  ;;  %2928 = vmatprep.subr.bf16.mxu0 %v2927_v10  ;;  %v2157_v56 = vshrl.u32 %v2156_v55, 7  ;;  %vm2348_vm4 = vcmp.lt.s32.totalorder %v2156_v55, 512 }
 0x546   : > { %v2006_v17 = vadd.f32 %v2005_v1, %v1867_v8  ;;  %v2112_v18 = vpop.f32.mrb[67].mxu1  ;;  %v3240_v19 = vpop.eup %3239  ;;  %3259 = vtanh.f32 %v2004_v12  ;;  %2940 = vmatprep.subr.bf16.mxu1 %v2939_v13  ;;  %2930 = vmatpush1.bf16.msra.mxu0 %v2929_v2 }
 0x547   : > { %v2113_v20 = vadd.f32 %v2112_v18, %v1867_v8  ;;  %v3242_v21 = vpop.eup %3241  ;;  %3261 = vtanh.f32 %v2111_v15  ;;  %2942 = vmatpush1.bf16.msra.mxu1 %v2941_v5  ;;  %v2009_v23 = vpop.f32.mrb[68].mxu0  ;;  %v2158_v59 = vsub.s32 0, %v2157_v56  ;;  %v2328_v4 = vsub.s32 %v2325_v61, %v2157_v56 }
 0x548   : > { %v3244_v24 = vpop.eup %3243  ;;  %3263 = vtanh.f32 %v2006_v17  ;;  %v2116_v25 = vpop.f32.mrb[68].mxu1  ;;  %v2010_v34 = vadd.f32 %v2009_v23, %v1872_v22 }
 0x549   : > { %v2011_v26 = vpop.f32.mrb[69].mxu0  ;;  %v3246_v27 = vpop.eup %3245  ;;  %3265 = vtanh.f32 %v2113_v20  ;;  %v2933_v30 = vpack.c.bf16 %v3244_v24, %v3236_v11  ;;  %v2117_v37 = vadd.f32 %v2116_v25, %v1872_v22 }
 0x54a   : > { %v2012_v28 = vadd.f32 %v2011_v26, %v1872_v22  ;;  %v2118_v29 = vpop.f32.mrb[69].mxu1  ;;  %v3248_v16 = vpop.eup %3247  ;;  %v2945_v32 = vpack.c.bf16 %v3246_v27, %v3238_v14 }
 0x54b   : > { %v2119_v31 = vadd.f32 %v2118_v29, %v1872_v22  ;;  %v3250_v33 = vpop.eup %3249  ;;  %v2931_v35 = vpack.c.bf16 %v3248_v16, %v3240_v19  ;;  %v2154_v60 = vpop.permute.xlu1 %2153 }
 0x54c   : > { %v3252_v36 = vpop.eup %3251  ;;  %3267 = vtanh.f32 %v2012_v28  ;;  %v2943_v38 = vpack.c.bf16 %v3250_v33, %v3242_v21  ;;  %v2159_v62 = vrot.slane %v2154_v60, %v2158_v59 }
 0x54d   : > { %v3254_v39 = vpop.eup %3253  ;;  %3269 = vtanh.f32 %v2119_v31  ;;  %2932 = vmatprep.subr.bf16.mxu0 %v2931_v35 }
 0x54e   : > { %v3256_v40 = vpop.eup %3255  ;;  %2944 = vmatprep.subr.bf16.mxu1 %v2943_v38  ;;  %2934 = vmatpush1.bf16.msra.mxu0 %v2933_v30  ;;  %3271 = vtanh.f32 %v2010_v34 }
 0x54f   : > { %v3258_v41 = vpop.eup %3257  ;;  %2946 = vmatpush1.bf16.msra.mxu1 %v2945_v32  ;;  %3273 = vtanh.f32 %v2117_v37 }
 0x550   : > { %v3260_v42 = vpop.eup %3259 }
 0x551   : > { %v3262_v43 = vpop.eup %3261  ;;  %v2937_v44 = vpack.c.bf16 %v3260_v42, %v3252_v36 }
 0x552   : > { %v3264_v45 = vpop.eup %3263  ;;  %v2949_v46 = vpack.c.bf16 %v3262_v43, %v3254_v39 }
 0x553   : > { %v3266_v47 = vpop.eup %3265  ;;  %v2935_v48 = vpack.c.bf16 %v3264_v45, %v3256_v40 }
 0x554   : > { %v2947_v49 = vpack.c.bf16 %v3266_v47, %v3258_v41 }
 0x555   : > { %2936 = vmatprep.subr.bf16.mxu0 %v2935_v48 }
 0x556   : > { %v3268_v50 = vpop.eup %3267  ;;  %2948 = vmatprep.subr.bf16.mxu1 %v2947_v49  ;;  %2938 = vmatpush1.bf16.msra.mxu0 %v2937_v44 }
 0x557   : > { %v3270_v51 = vpop.eup %3269  ;;  %2950 = vmatpush1.bf16.msra.mxu1 %v2949_v46  ;;  %2631 = vmatprep.subr.msk.mxu0 %vm916_vm2, %v3268_v50 }
 0x558   : > { %2634 = vmatprep.subr.msk.mxu1 %vm916_vm2, %v3270_v51  ;;  %v3272_v53 = vpop.eup %3271 }
 0x559   : > { %v3274_v54 = vpop.eup %3273 }
 0x55a   : > { %2632 = vmatpush1.msk.msra.mxu0 %vm916_vm2, %v3272_v53 }
 0x55b   : > { %2635 = vmatpush1.msk.msra.mxu1 %vm916_vm2, %v3274_v54  ;;  %2633 = vmatmul.mubr.msk.f32.vlgmr.msra.gmra.mrb[70].mxu0 %vm894_vm3, %v2149_v52 }
 0x55c   : > { %2636 = vmatmul.mubr.msk.f32.vlgmr.msra.gmra.mrb[70].mxu1 %vm894_vm3, %v2149_v52 }
 0x62e   : > { %v2241_v63 = vpop.f32.mrb[70].mxu0 }
 0x62f   : > { %v2242_v0 = vadd.f32 %v2241_v63, %v2159_v62  ;;  %v2312_v2 = vpop.f32.mrb[70].mxu1  ;;  %v2243_v3 = vpop.f32.mrb[71].mxu0 }
 0x630   : > { %v2313_v5 = vadd.f32 %v2312_v2, %v2159_v62  ;;  %v2244_v6 = vadd.f32 %v2243_v3, %v2159_v62  ;;  %v2314_v8 = vpop.f32.mrb[71].mxu1 }
 0x631   : > { %v2315_v9 = vadd.f32 %v2314_v8, %v2159_v62 }
 0x632   : > { %v2321_v10 = vcombine.low %v2242_v0, %v2244_v6 }
 0x633   : > { %v2322_v11 = vcombine.low %v2313_v5, %v2315_v9 }
 0x634   : > { %v2329_v12 = vrot.slane %v2321_v10, %v2328_v4 }
 0x635   : > { %v2336_v7 = vrot.slane %v2322_v11, %v2328_v4 }
 0x637   : > { %v2337_v1 = vcombine.low %v2329_v12, %v2336_v7 }
 0x639   : > { %v2344_v13 = vrot.slane %v2337_v1, %v2328_v4 }
 0x63b   : > { %2350 = vst.msk [vmem:[%s259_s19] sm:$0xf] %vm2348_vm4, %v2344_v13 }
 0x63c   : > { %3288 = shalt.err (!%p3285_p3)
}
 0x63d   : > { %s3289_s10 = scalar_lea.hbm %s3957_s29, 64  ;;  %s3293_s15 = scalar_lea.hbm %s4005_s6, 128 }
 0x63e   : > { %p3290_p4 = scmp.ne.s32.totalorder %s3957_s29, %s3289_s10  ;;  %p3294_p9 = scmp.lt.u32.totalorder %s3957_s29, %s4005_s6 }
 0x63f   : > { %p3295_p10 = scmp.lt.u32.totalorder %s3293_s15, %s3289_s10  ;;  %p3297_p12 = scmp.lt.u32.totalorder %s3289_s10, %s3957_s29 }
 0x640   : > { %p3291_p7 = pnand %p3290_p4, %p3416_p5 }
 0x641   : > { %p3296_p11 = por %p3295_p10, %p3294_p9 }
 0x642   : > { %p3292_p8 = pneg %p3291_p7 }
 0x643   : > { %p3298_p13 = por %p3297_p12, %p3296_p11 }
 0x645   : > { %p3299_p0 = pnand %p3298_p13, %p3292_p8 }
 0x647   : > { %3302 = shalt.err (!%p3299_p0)
}
 0x648   : > { %2951 = dma.vmem_to_hbm [thread:$0]  (%p3416_p5), %s3959_s20, 64, %s3957_s29, %s2352_s5  }
 0x649 PF: > { %p2957_p1 = scmp.ge.s32.totalorder %s3337_s26, 2  ;;  %s2378_s18 = sand.u32 1, %s3325_s23  }
 0x64a   : > { %s2379_s19 = scalar_lea.sflag [#allocation4], %s2378_s18 }
 0x64b   : > { %p2954_p2 = pnand %p2957_p1, %p3420_p6 }
 0x64d   : > { %3320 = dma.done.wait (!%p2954_p2), %s2379_s19, 64  }
 0x64e   : > { %3322 = vsyncadd (!%p2954_p2), %s2379_s19, 4294967232  ;;  %p18_p3 = scmp.ge.s32.totalorder %s3404_s28, 4   ;;  %s4010_s23 = smov %s3329_s24 }
 0x64f   : > { %s4011_s24 = smov %s3333_s25  ;;  %s4012_s25 = smov %s3414_s7 }
 0x650   : > { %s4013_s26 = smov %s3404_s28  ;;  %20 = sbr.rel (!%p18_p3) target bundleno = 6 (0x6), region = 86 }
 0x657   :  { %2384 = vsyncpa [#allocation4], 1 }
 0x658   :  { %2386 = vsyncpa [#allocation4 + $0x1], 1 }

</bundles_post_ra>
